<compile_context>
chip_gen: v7x
topology: tpu7x:2x2x1
jax: 0.10.0
libtpu: 0.0.40
codegen_flags: <defaults>
</compile_context>

<pallas_src>
import functools

import jax
import jax.numpy as jnp
from jax.experimental import pallas as pl
from jax.experimental.pallas import tpu as pltpu

EPS = 1e-5  # nn.InstanceNorm2d default eps


# ----------------------------------------------------------------------------
# Banded ("Toeplitz") weight construction — plain JAX, tiny, runs per forward.
# Folds the KW taps + W-direction zero padding of a stride-1 conv into a
# (W*Cin, W*Cout) matrix per KH row tap, then stacks the KH taps along K.
# ----------------------------------------------------------------------------
def _banded_weight_folded(weight, W, pad):
    """weight: (Cout, Cin, KH, KW) torch layout -> (KH*W*Cin, W*Cout)."""
    Cout, Cin, KH, KW = weight.shape
    w_t = jnp.transpose(weight, (2, 3, 1, 0)).astype(jnp.float32)  # (KH,KW,Cin,Cout)
    cols = jnp.arange(W)
    M = jnp.zeros((KH, W * Cin, W * Cout), jnp.float32)
    for dx in range(KW):
        wi = cols + dx - pad                              # input col per output col
        valid = (wi >= 0) & (wi < W)
        P = ((wi[None, :] == cols[:, None]) & valid[None, :]).astype(jnp.float32)
        M = M + jnp.einsum('io,kcd->kicod', P, w_t[:, dx]).reshape(
            KH, W * Cin, W * Cout)
    # K layout: [dy=0 block | dy=1 block | ...] to match the in-kernel operand
    # built as concat([x_pad[dy:dy+H] for dy in range(KH)], axis=lanes).
    return M.reshape(KH * W * Cin, W * Cout)


# ----------------------------------------------------------------------------
# Host-built constant matrices (hoisted out of the kernel).
# ----------------------------------------------------------------------------
def _channel_matrices(W, C):
    """G (W*C, C): reduce lane groups -> channels. Bc (C, W*C): broadcast back."""
    N = W * C
    lanes = jnp.arange(N)
    chans = jnp.arange(C)
    G = (lanes[:, None] % C == chans[None, :]).astype(jnp.float32)
    return G, G.T


def _pool_select_matrices(H, W, C, dtype):
    """Rsel (H/2, H) selects even rows; Psel (W*C, (W/2)*C) selects even w-groups."""
    Rsel = (2 * jnp.arange(H // 2)[:, None] == jnp.arange(H)[None, :]).astype(dtype)
    lanes = jnp.arange(W * C)
    outl = jnp.arange((W // 2) * C)
    src = 2 * (outl // C) * C + (outl % C)
    Psel = (lanes[:, None] == src[None, :]).astype(dtype)
    return Rsel, Psel


# ----------------------------------------------------------------------------
# Fused chain of ConvBlocks: conv (one fat banded matmul per layer-input) +
# InstanceNorm + ReLU, one image per grid step.  Layer 0 may take several
# inputs (fused channel concat).  Optionally emits a fused 2x2 max-pool of the
# final activation as a second output.
# ----------------------------------------------------------------------------
def _conv_chain_kernel(*refs, H, W, layers, n_in, n_w, pool, compute_dtype):
    n_layers = len(layers)
    p = 0
    x_refs = refs[p:p + n_in]; p += n_in
    w_refs = refs[p:p + n_w]; p += n_w
    g_refs = refs[p:p + n_layers]; p += n_layers
    b_refs = refs[p:p + n_layers]; p += n_layers
    if pool:
        rsel_ref, psel_ref = refs[p], refs[p + 1]; p += 2
    o_ref = refs[p]; p += 1
    pool_ref = refs[p] if pool else None

    cur = [x_refs[i][0].astype(compute_dtype) for i in range(n_in)]
    widx = 0
    y = None
    for li, (KH, pad, Cout) in enumerate(layers):
        N = W * Cout
        acc = jnp.zeros((H, N), jnp.float32)
        for x in cur:
            wref = w_refs[widx]; widx += 1
            if pad == 0:                                   # 1x1 conv, no halo
                op = x
            else:                                          # fold KH taps into K
                Nin = x.shape[1]
                z = jnp.zeros((pad, Nin), x.dtype)
                xp = jnp.concatenate([z, x, z], axis=0)    # (H+2*pad, Nin)
                op = jnp.concatenate([xp[dy:dy + H, :] for dy in range(KH)],
                                     axis=1)               # (H, KH*Nin)
            acc = acc + jnp.dot(op, wref[...], preferred_element_type=jnp.float32)

        # InstanceNorm2d(affine=False) + ReLU.  Channel c lives in lanes
        # {w*Cout + c}; reduce/broadcast via the hoisted 0/1 matrices.  The
        # four M=1 stat matmuls are fused into two M=2 matmuls.
        inv_cnt = 1.0 / float(H * W)
        s = jnp.concatenate([jnp.sum(acc, axis=0, keepdims=True),
                             jnp.sum(acc * acc, axis=0, keepdims=True)],
                            axis=0)                                      # (2, N)
        st = jnp.dot(s, g_refs[li][...],
                     preferred_element_type=jnp.float32) * inv_cnt        # (2, Cout)
        mean, ex2 = st[0:1, :], st[1:2, :]
        inv = jax.lax.rsqrt(ex2 - mean * mean + EPS)
        coef = jnp.concatenate([inv, mean * inv], axis=0)                 # (2, Cout)
        cb = jnp.dot(coef, b_refs[li][...],
                     preferred_element_type=jnp.float32)                  # (2, N)
        y = jnp.maximum(acc * cb[0:1, :] - cb[1:2, :], 0.0)               # (H, N)
        cur = [y.astype(compute_dtype)]

    o_ref[...] = y.reshape(1, H, y.shape[1]).astype(o_ref.dtype)

    if pool:
        Cout = layers[-1][2]
        N = y.shape[1]
        # max over the 2x2 window via one row shift + one lane-group shift.
        ydn = jnp.concatenate([y[1:, :], y[:1, :]], axis=0)        # row h+1
        rc = jnp.maximum(y, ydn)
        rsh = jnp.concatenate([rc[:, Cout:], rc[:, :Cout]], axis=1)  # col w+1 group
        cand = jnp.maximum(rc, rsh).astype(compute_dtype)
        # exact stride-2 selection via 0/1 bf16 matmuls (no masked/strided stores).
        rows = jnp.dot(rsel_ref[...], cand,
                       preferred_element_type=jnp.float32).astype(compute_dtype)
        pooled = jnp.dot(rows, psel_ref[...], preferred_element_type=jnp.float32)
        pool_ref[...] = pooled.reshape(1, H // 2, N // 2).astype(pool_ref.dtype)


def conv_chain(xs, layers, *, H, W, out_dtype=jnp.float32, pool=False,
               pool_dtype=None, compute_dtype=jnp.bfloat16):
    """Run a fused chain of ConvBlocks (conv + InstanceNorm + ReLU) in one
    pallas_call.

    xs:     list of lane-flat inputs, each (B, H, W*Cin_i), any float dtype.
    layers: list of (weights, pad); `weights` is a list of torch-layout conv
            weights (Cout, Cin_i, KH, KW).  Layer 0 has one weight per entry of
            `xs` (channel split of the real conv weight == fused concat);
            later layers have a single weight.
    pool:   also emit MaxPool2d(2,2) of the final activation as a 2nd output.
    """
    B = xs[0].shape[0]
    n_in = len(xs)
    assert len(layers[0][0]) == n_in
    for x, wt in zip(xs, layers[0][0]):
        assert x.shape[1] == H and x.shape[2] == W * wt.shape[1]

    banded, gmats, bmats, cfg = [], [], [], []
    for wts, pad in layers:
        Cout, _, KH, KW = wts[0].shape
        if pad == 0:
            assert KH == 1 and KW == 1, "pad=0 path only supports 1x1 convs"
        cfg.append((KH, pad, Cout))
        for wt in wts:
            banded.append(_banded_weight_folded(wt, W, pad).astype(compute_dtype))
        G, Bc = _channel_matrices(W, Cout)
        gmats.append(G)
        bmats.append(Bc)
    N_out = W * cfg[-1][2]

    xs_c = [x.astype(compute_dtype) for x in xs]
    consts = list(banded) + list(gmats) + list(bmats)
    if pool:
        Rsel, Psel = _pool_select_matrices(H, W, cfg[-1][2], compute_dtype)
        consts += [Rsel, Psel]

    kern = functools.partial(_conv_chain_kernel, H=H, W=W, layers=tuple(cfg),
                             n_in=n_in, n_w=len(banded), pool=pool,
                             compute_dtype=compute_dtype)

    in_specs = [pl.BlockSpec((1, H, int(x.shape[2])), lambda i: (i, 0, 0))
                for x in xs_c]
    # Grid-invariant constants: full-array blocks, constant index_map.
    in_specs += [pl.BlockSpec(c.shape, lambda i: (0, 0)) for c in consts]

    if pool:
        pool_dtype = pool_dtype or out_dtype
        out_shape = (jax.ShapeDtypeStruct((B, H, N_out), out_dtype),
                     jax.ShapeDtypeStruct((B, H // 2, N_out // 2), pool_dtype))
        out_specs = (pl.BlockSpec((1, H, N_out), lambda i: (i, 0, 0)),
                     pl.BlockSpec((1, H // 2, N_out // 2), lambda i: (i, 0, 0)))
    else:
        out_shape = jax.ShapeDtypeStruct((B, H, N_out), out_dtype)
        out_specs = pl.BlockSpec((1, H, N_out), lambda i: (i, 0, 0))

    return pl.pallas_call(
        kern,
        out_shape=out_shape,
        grid_spec=pltpu.PrefetchScalarGridSpec(
            num_scalar_prefetch=0,
            grid=(B,),
            in_specs=in_specs,
            out_specs=out_specs,
        ),
        compiler_params=pltpu.CompilerParams(
            dimension_semantics=("parallel",),
            vmem_limit_bytes=32 * 1024 * 1024),
    )(*xs_c, *consts)


# ----------------------------------------------------------------------------
# PixelShuffle(2) -- pure data movement, plain JAX (NHWC), runs in bf16.
# ----------------------------------------------------------------------------
def pixel_shuffle(x_nhwc, r=2):
    B, H, W, C = x_nhwc.shape
    Cout = C // (r * r)
    x = x_nhwc.reshape(B, H, W, Cout, r, r)          # channel k = c*r*r + i*r + j
    x = jnp.transpose(x, (0, 1, 4, 2, 5, 3))         # (B, H, i, W, j, Cout)
    return x.reshape(B, H * r, W * r, Cout)


# ----------------------------------------------------------------------------
# Parameter init (kaiming_normal_ like ConvBlock.__init__; conv bias omitted —
# InstanceNorm2d(affine=False) cancels a per-channel constant exactly).
# ----------------------------------------------------------------------------
def init_conv_weight(key, cout, cin, k):
    fan_in = cin * k * k
    std = (2.0 / fan_in) ** 0.5
    return std * jax.random.normal(key, (cout, cin, k, k), jnp.float32)


def init_ublock_params(key, in_channels, out_channels):
    ks = jax.random.split(key, 6)
    co = out_channels
    return {
        "pre1":   init_conv_weight(ks[0], co, in_channels, 3),
        "pre2":   init_conv_weight(ks[1], co, co, 3),
        # `branch` is an arbitrary user-supplied nn.Module (co -> 2*co at half
        # resolution); instantiated here as a single ConvBlock.
        "branch": init_conv_weight(ks[2], 2 * co, co, 3),
        "up":     init_conv_weight(ks[3], 4 * co, 2 * co, 1),
        "post1":  init_conv_weight(ks[4], co, 2 * co, 3),
        "post2":  init_conv_weight(ks[5], co, co, 3),
    }


# ----------------------------------------------------------------------------
# UBlock forward (NCHW in / NCHW out, matching the PyTorch module).
# ----------------------------------------------------------------------------
def ublock_forward(x_nchw, params):
    B, Cin, H, W = x_nchw.shape
    co = params["pre1"].shape[0]

    x = jnp.transpose(x_nchw, (0, 2, 3, 1)).reshape(B, H, W * Cin)

    # self.pre (two ConvBlocks) + F.max_pool2d(., 2, 2) fused into one call.
    out, pooled = conv_chain(
        [x], [([params["pre1"]], 1), ([params["pre2"]], 1)],
        H=H, W=W, out_dtype=jnp.bfloat16, pool=True)
    # out: (B, H, W*co) bf16     pooled: (B, H/2, (W/2)*co) bf16

    # self.branch (ConvBlock co->2co) + upsample's 1x1 ConvBlock (2co->4co)
    # fused into one pallas_call at half resolution.
    br = conv_chain([pooled], [([params["branch"]], 1), ([params["up"]], 0)],
                    H=H // 2, W=W // 2, out_dtype=jnp.bfloat16)

    # nn.PixelShuffle(2): pure data movement at bf16 (left to XLA).
    br = pixel_shuffle(br.reshape(B, H // 2, W // 2, 4 * co), 2)  # (B,H,W,co)
    br = br.reshape(B, H, W * co)

    # torch.cat((output, branch), dim=1) + self.post, all in one pallas_call:
    # the concat is fused by passing both tensors and splitting post1's weight.
    w_post1 = params["post1"]
    y = conv_chain([out, br],
                   [([w_post1[:, :co], w_post1[:, co:]], 1),
                    ([params["post2"]], 1)],
                   H=H, W=W, out_dtype=jnp.float32)               # (B,H,W*co) f32

    return jnp.transpose(y.reshape(B, H, W, co), (0, 3, 1, 2))    # NHWC -> NCHW


# ----------------------------------------------------------------------------
# Pure-JAX reference of the PyTorch UBlock (for correctness checking).
# ----------------------------------------------------------------------------
def _ref_conv_in_relu(x, w, pad):
    y = jax.lax.conv_general_dilated(
        x, w, window_strides=(1, 1), padding=[(pad, pad), (pad, pad)],
        dimension_numbers=("NCHW", "OIHW", "NCHW"))
    mean = jnp.mean(y, axis=(2, 3), keepdims=True)
    var = jnp.var(y, axis=(2, 3), keepdims=True)
    return jnp.maximum((y - mean) * jax.lax.rsqrt(var + EPS), 0.0)


def _ref_pixel_shuffle_nchw(x, r=2):
    B, C, H, W = x.shape
    x = x.reshape(B, C // (r * r), r, r, H, W)
    x = jnp.transpose(x, (0, 1, 4, 2, 5, 3))
    return x.reshape(B, C // (r * r), H * r, W * r)


def ublock_reference(x, params):
    out = _ref_conv_in_relu(x, params["pre1"], 1)
    out = _ref_conv_in_relu(out, params["pre2"], 1)
    br = jax.lax.reduce_window(out, -jnp.inf, jax.lax.max,
                               (1, 1, 2, 2), (1, 1, 2, 2), "VALID")
    br = _ref_conv_in_relu(br, params["branch"], 1)
    br = _ref_conv_in_relu(br, params["up"], 0)
    br = _ref_pixel_shuffle_nchw(br, 2)
    y = jnp.concatenate([out, br], axis=1)
    y = _ref_conv_in_relu(y, params["post1"], 1)
    y = _ref_conv_in_relu(y, params["post2"], 1)
    return y


if __name__ == "__main__":
    B, Cin, H, W = 2, 4, 16, 16
    out_channels = 8

    key = jax.random.PRNGKey(0)
    k_x, k_p = jax.random.split(key)
    x = jax.random.normal(k_x, (B, Cin, H, W), jnp.float32)   # NCHW like PyTorch
    params = init_ublock_params(k_p, Cin, out_channels)

    y = jax.block_until_ready(jax.jit(ublock_forward)(x, params))
    assert y.shape == (B, out_channels, H, W), y.shape
    assert bool(jnp.isfinite(y).all())

    # Correctness: compare against the pure-JAX (f32) reference; the Pallas path
    # uses bf16 matmul operands / bf16 intermediates, so allow a loose tolerance.
    y_ref = jax.block_until_ready(jax.jit(ublock_reference)(x, params))
    err = float(jnp.max(jnp.abs(y - y_ref)))
    assert err < 0.25, f"max abs err vs reference: {err}"

    print("KERNEL_OK")
</pallas_src>

<mosaic_0001>
module attributes {stable_mosaic.version = 11 : i64} {
  func.func @_conv_chain_kernel(%arg0: i32, %arg1: memref<1x16x64xbf16, #tpu.memory_space<vmem>>, %arg2: memref<192x128xbf16, #tpu.memory_space<vmem>>, %arg3: memref<384x128xbf16, #tpu.memory_space<vmem>>, %arg4: memref<128x8xf32, #tpu.memory_space<vmem>>, %arg5: memref<128x8xf32, #tpu.memory_space<vmem>>, %arg6: memref<8x128xf32, #tpu.memory_space<vmem>>, %arg7: memref<8x128xf32, #tpu.memory_space<vmem>>, %arg8: memref<8x16xbf16, #tpu.memory_space<vmem>>, %arg9: memref<128x64xbf16, #tpu.memory_space<vmem>>, %arg10: memref<1x16x128xbf16, #tpu.memory_space<vmem>>, %arg11: memref<1x8x64xbf16, #tpu.memory_space<vmem>>) attributes {dimension_semantics = [#tpu.dimension_semantics<parallel>], iteration_bounds = array<i64: 2>, scalar_prefetch = 0 : i64, scratch_operands = 0 : i64, tpu.core_type = #tpu.core_type<tc>, window_params = [{transform_indices = @transform_0, window_bounds = array<i64: 1, 16, 64>}, {pipeline_mode = #tpu.pipeline_mode<synchronous>, transform_indices = @transform_1, window_bounds = array<i64: 192, 128>}, {pipeline_mode = #tpu.pipeline_mode<synchronous>, transform_indices = @transform_2, window_bounds = array<i64: 384, 128>}, {pipeline_mode = #tpu.pipeline_mode<synchronous>, transform_indices = @transform_3, window_bounds = array<i64: 128, 8>}, {pipeline_mode = #tpu.pipeline_mode<synchronous>, transform_indices = @transform_4, window_bounds = array<i64: 128, 8>}, {pipeline_mode = #tpu.pipeline_mode<synchronous>, transform_indices = @transform_5, window_bounds = array<i64: 8, 128>}, {pipeline_mode = #tpu.pipeline_mode<synchronous>, transform_indices = @transform_6, window_bounds = array<i64: 8, 128>}, {pipeline_mode = #tpu.pipeline_mode<synchronous>, transform_indices = @transform_7, window_bounds = array<i64: 8, 16>}, {pipeline_mode = #tpu.pipeline_mode<synchronous>, transform_indices = @transform_8, window_bounds = array<i64: 128, 64>}, {transform_indices = @transform_9, window_bounds = array<i64: 1, 16, 128>}, {transform_indices = @transform_10, window_bounds = array<i64: 1, 8, 64>}]} {
    %c0 = arith.constant 0 : index
    %c0_0 = arith.constant 0 : index
    %c0_1 = arith.constant 0 : index
    %0 = vector.load %arg1[%c0, %c0_0, %c0_1] : memref<1x16x64xbf16, #tpu.memory_space<vmem>>, vector<1x16x64xbf16>
    %1 = vector.shape_cast %0 : vector<1x16x64xbf16> to vector<16x64xbf16>
    %cst = arith.constant 0.000000e+00 : f32
    %2 = vector.broadcast %cst : f32 to vector<16x128xf32>
    %cst_2 = arith.constant 0.000000e+00 : bf16
    %3 = vector.broadcast %cst_2 : bf16 to vector<1x64xbf16>
    %4 = tpu.concatenate %3, %1, %3 in 0 : vector<1x64xbf16>, vector<16x64xbf16>, vector<1x64xbf16> -> vector<18x64xbf16>
    %5 = vector.extract_strided_slice %4 {offsets = [0, 0], sizes = [16, 64], strides = [1, 1]} : vector<18x64xbf16> to vector<16x64xbf16>
    %6 = vector.extract_strided_slice %4 {offsets = [1, 0], sizes = [16, 64], strides = [1, 1]} : vector<18x64xbf16> to vector<16x64xbf16>
    %7 = vector.extract_strided_slice %4 {offsets = [2, 0], sizes = [16, 64], strides = [1, 1]} : vector<18x64xbf16> to vector<16x64xbf16>
    %8 = tpu.concatenate %5, %6, %7 in 1 : vector<16x64xbf16>, vector<16x64xbf16>, vector<16x64xbf16> -> vector<16x192xbf16>
    %c0_3 = arith.constant 0 : index
    %c0_4 = arith.constant 0 : index
    %9 = vector.load %arg2[%c0_3, %c0_4] : memref<192x128xbf16, #tpu.memory_space<vmem>>, vector<192x128xbf16>
    %cst_5 = arith.constant dense<0.000000e+00> : vector<16x128xf32>
    %10 = tpu.matmul %8, %9, %cst_5 {dimension_numbers = #tpu.dot_dimension_numbers<[1], [0], [0], [1], [0, 0, 1, 1], [], []>} : vector<16x192xbf16>, vector<192x128xbf16>, vector<16x128xf32> -> vector<16x128xf32>
    %11 = arith.addf %2, %10 : vector<16x128xf32>
    %cst_6 = arith.constant dense<0.000000e+00> : vector<128xf32>
    %12 = vector.multi_reduction <add>, %11, %cst_6 [0] : vector<16x128xf32> to vector<128xf32>
    %13 = vector.shape_cast %12 : vector<128xf32> to vector<1x128xf32>
    %14 = arith.mulf %11, %11 : vector<16x128xf32>
    %cst_7 = arith.constant dense<0.000000e+00> : vector<128xf32>
    %15 = vector.multi_reduction <add>, %14, %cst_7 [0] : vector<16x128xf32> to vector<128xf32>
    %16 = vector.shape_cast %15 : vector<128xf32> to vector<1x128xf32>
    %17 = tpu.concatenate %13, %16 in 0 : vector<1x128xf32>, vector<1x128xf32> -> vector<2x128xf32>
    %c0_8 = arith.constant 0 : index
    %c0_9 = arith.constant 0 : index
    %18 = vector.load %arg4[%c0_8, %c0_9] : memref<128x8xf32, #tpu.memory_space<vmem>>, vector<128x8xf32>
    %cst_10 = arith.constant dense<0.000000e+00> : vector<2x8xf32>
    %19 = tpu.matmul %17, %18, %cst_10 {dimension_numbers = #tpu.dot_dimension_numbers<[1], [0], [0], [1], [0, 0, 1, 1], [], []>} : vector<2x128xf32>, vector<128x8xf32>, vector<2x8xf32> -> vector<2x8xf32>
    %cst_11 = arith.constant 3.906250e-03 : f32
    %20 = vector.broadcast %cst_11 : f32 to vector<2x8xf32>
    %21 = arith.mulf %19, %20 : vector<2x8xf32>
    %22 = vector.extract_strided_slice %21 {offsets = [0, 0], sizes = [1, 8], strides = [1, 1]} : vector<2x8xf32> to vector<1x8xf32>
    %23 = vector.extract_strided_slice %21 {offsets = [1, 0], sizes = [1, 8], strides = [1, 1]} : vector<2x8xf32> to vector<1x8xf32>
    %24 = arith.mulf %22, %22 : vector<1x8xf32>
    %25 = arith.subf %23, %24 : vector<1x8xf32>
    %cst_12 = arith.constant 9.99999974E-6 : f32
    %26 = vector.broadcast %cst_12 : f32 to vector<1x8xf32>
    %27 = arith.addf %25, %26 : vector<1x8xf32>
    %28 = math.rsqrt %27 : vector<1x8xf32>
    %29 = arith.mulf %22, %28 : vector<1x8xf32>
    %30 = tpu.concatenate %28, %29 in 0 : vector<1x8xf32>, vector<1x8xf32> -> vector<2x8xf32>
    %c0_13 = arith.constant 0 : index
    %c0_14 = arith.constant 0 : index
    %31 = vector.load %arg6[%c0_13, %c0_14] : memref<8x128xf32, #tpu.memory_space<vmem>>, vector<8x128xf32>
    %cst_15 = arith.constant dense<0.000000e+00> : vector<2x128xf32>
    %32 = tpu.matmul %30, %31, %cst_15 {dimension_numbers = #tpu.dot_dimension_numbers<[1], [0], [0], [1], [0, 0, 1, 1], [], []>} : vector<2x8xf32>, vector<8x128xf32>, vector<2x128xf32> -> vector<2x128xf32>
    %33 = vector.extract_strided_slice %32 {offsets = [0, 0], sizes = [1, 128], strides = [1, 1]} : vector<2x128xf32> to vector<1x128xf32>
    %34 = vector.broadcast %33 : vector<1x128xf32> to vector<16x128xf32>
    %35 = arith.mulf %11, %34 : vector<16x128xf32>
    %36 = vector.extract_strided_slice %32 {offsets = [1, 0], sizes = [1, 128], strides = [1, 1]} : vector<2x128xf32> to vector<1x128xf32>
    %37 = vector.broadcast %36 : vector<1x128xf32> to vector<16x128xf32>
    %38 = arith.subf %35, %37 : vector<16x128xf32>
    %cst_16 = arith.constant 0.000000e+00 : f32
    %39 = vector.broadcast %cst_16 : f32 to vector<16x128xf32>
    %40 = arith.maximumf %38, %39 : vector<16x128xf32>
    %41 = arith.truncf %40 : vector<16x128xf32> to vector<16x128xbf16>
    %cst_17 = arith.constant 0.000000e+00 : f32
    %42 = vector.broadcast %cst_17 : f32 to vector<16x128xf32>
    %cst_18 = arith.constant 0.000000e+00 : bf16
    %43 = vector.broadcast %cst_18 : bf16 to vector<1x128xbf16>
    %44 = tpu.concatenate %43, %41, %43 in 0 : vector<1x128xbf16>, vector<16x128xbf16>, vector<1x128xbf16> -> vector<18x128xbf16>
    %45 = vector.extract_strided_slice %44 {offsets = [0, 0], sizes = [16, 128], strides = [1, 1]} : vector<18x128xbf16> to vector<16x128xbf16>
    %46 = vector.extract_strided_slice %44 {offsets = [1, 0], sizes = [16, 128], strides = [1, 1]} : vector<18x128xbf16> to vector<16x128xbf16>
    %47 = vector.extract_strided_slice %44 {offsets = [2, 0], sizes = [16, 128], strides = [1, 1]} : vector<18x128xbf16> to vector<16x128xbf16>
    %48 = tpu.concatenate %45, %46, %47 in 1 : vector<16x128xbf16>, vector<16x128xbf16>, vector<16x128xbf16> -> vector<16x384xbf16>
    %c0_19 = arith.constant 0 : index
    %c0_20 = arith.constant 0 : index
    %49 = vector.load %arg3[%c0_19, %c0_20] : memref<384x128xbf16, #tpu.memory_space<vmem>>, vector<384x128xbf16>
    %cst_21 = arith.constant dense<0.000000e+00> : vector<16x128xf32>
    %50 = tpu.matmul %48, %49, %cst_21 {dimension_numbers = #tpu.dot_dimension_numbers<[1], [0], [0], [1], [0, 0, 1, 1], [], []>} : vector<16x384xbf16>, vector<384x128xbf16>, vector<16x128xf32> -> vector<16x128xf32>
    %51 = arith.addf %42, %50 : vector<16x128xf32>
    %cst_22 = arith.constant dense<0.000000e+00> : vector<128xf32>
    %52 = vector.multi_reduction <add>, %51, %cst_22 [0] : vector<16x128xf32> to vector<128xf32>
    %53 = vector.shape_cast %52 : vector<128xf32> to vector<1x128xf32>
    %54 = arith.mulf %51, %51 : vector<16x128xf32>
    %cst_23 = arith.constant dense<0.000000e+00> : vector<128xf32>
    %55 = vector.multi_reduction <add>, %54, %cst_23 [0] : vector<16x128xf32> to vector<128xf32>
    %56 = vector.shape_cast %55 : vector<128xf32> to vector<1x128xf32>
    %57 = tpu.concatenate %53, %56 in 0 : vector<1x128xf32>, vector<1x128xf32> -> vector<2x128xf32>
    %c0_24 = arith.constant 0 : index
    %c0_25 = arith.constant 0 : index
    %58 = vector.load %arg5[%c0_24, %c0_25] : memref<128x8xf32, #tpu.memory_space<vmem>>, vector<128x8xf32>
    %cst_26 = arith.constant dense<0.000000e+00> : vector<2x8xf32>
    %59 = tpu.matmul %57, %58, %cst_26 {dimension_numbers = #tpu.dot_dimension_numbers<[1], [0], [0], [1], [0, 0, 1, 1], [], []>} : vector<2x128xf32>, vector<128x8xf32>, vector<2x8xf32> -> vector<2x8xf32>
    %cst_27 = arith.constant 3.906250e-03 : f32
    %60 = vector.broadcast %cst_27 : f32 to vector<2x8xf32>
    %61 = arith.mulf %59, %60 : vector<2x8xf32>
    %62 = vector.extract_strided_slice %61 {offsets = [0, 0], sizes = [1, 8], strides = [1, 1]} : vector<2x8xf32> to vector<1x8xf32>
    %63 = vector.extract_strided_slice %61 {offsets = [1, 0], sizes = [1, 8], strides = [1, 1]} : vector<2x8xf32> to vector<1x8xf32>
    %64 = arith.mulf %62, %62 : vector<1x8xf32>
    %65 = arith.subf %63, %64 : vector<1x8xf32>
    %cst_28 = arith.constant 9.99999974E-6 : f32
    %66 = vector.broadcast %cst_28 : f32 to vector<1x8xf32>
    %67 = arith.addf %65, %66 : vector<1x8xf32>
    %68 = math.rsqrt %67 : vector<1x8xf32>
    %69 = arith.mulf %62, %68 : vector<1x8xf32>
    %70 = tpu.concatenate %68, %69 in 0 : vector<1x8xf32>, vector<1x8xf32> -> vector<2x8xf32>
    %c0_29 = arith.constant 0 : index
    %c0_30 = arith.constant 0 : index
    %71 = vector.load %arg7[%c0_29, %c0_30] : memref<8x128xf32, #tpu.memory_space<vmem>>, vector<8x128xf32>
    %cst_31 = arith.constant dense<0.000000e+00> : vector<2x128xf32>
    %72 = tpu.matmul %70, %71, %cst_31 {dimension_numbers = #tpu.dot_dimension_numbers<[1], [0], [0], [1], [0, 0, 1, 1], [], []>} : vector<2x8xf32>, vector<8x128xf32>, vector<2x128xf32> -> vector<2x128xf32>
    %73 = vector.extract_strided_slice %72 {offsets = [0, 0], sizes = [1, 128], strides = [1, 1]} : vector<2x128xf32> to vector<1x128xf32>
    %74 = vector.broadcast %73 : vector<1x128xf32> to vector<16x128xf32>
    %75 = arith.mulf %51, %74 : vector<16x128xf32>
    %76 = vector.extract_strided_slice %72 {offsets = [1, 0], sizes = [1, 128], strides = [1, 1]} : vector<2x128xf32> to vector<1x128xf32>
    %77 = vector.broadcast %76 : vector<1x128xf32> to vector<16x128xf32>
    %78 = arith.subf %75, %77 : vector<16x128xf32>
    %cst_32 = arith.constant 0.000000e+00 : f32
    %79 = vector.broadcast %cst_32 : f32 to vector<16x128xf32>
    %80 = arith.maximumf %78, %79 : vector<16x128xf32>
    %81 = vector.shape_cast %80 : vector<16x128xf32> to vector<1x16x128xf32>
    %82 = arith.truncf %81 : vector<1x16x128xf32> to vector<1x16x128xbf16>
    %c0_33 = arith.constant 0 : index
    %c0_34 = arith.constant 0 : index
    %c0_35 = arith.constant 0 : index
    %83 = vector.load %arg10[%c0_33, %c0_34, %c0_35] : memref<1x16x128xbf16, #tpu.memory_space<vmem>>, vector<1x16x128xbf16>
    tpu.vector_store %arg10[%c0_33, %c0_34, %c0_35], %82 {strides = array<i32>} : memref<1x16x128xbf16, #tpu.memory_space<vmem>>, vector<1x16x128xbf16>,
    %84 = vector.extract_strided_slice %80 {offsets = [1, 0], sizes = [15, 128], strides = [1, 1]} : vector<16x128xf32> to vector<15x128xf32>
    %85 = vector.extract_strided_slice %80 {offsets = [0, 0], sizes = [1, 128], strides = [1, 1]} : vector<16x128xf32> to vector<1x128xf32>
    %86 = tpu.concatenate %84, %85 in 0 : vector<15x128xf32>, vector<1x128xf32> -> vector<16x128xf32>
    %87 = arith.maximumf %80, %86 : vector<16x128xf32>
    %88 = vector.extract_strided_slice %87 {offsets = [0, 8], sizes = [16, 120], strides = [1, 1]} : vector<16x128xf32> to vector<16x120xf32>
    %89 = vector.extract_strided_slice %87 {offsets = [0, 0], sizes = [16, 8], strides = [1, 1]} : vector<16x128xf32> to vector<16x8xf32>
    %90 = tpu.concatenate %88, %89 in 1 : vector<16x120xf32>, vector<16x8xf32> -> vector<16x128xf32>
    %91 = arith.maximumf %87, %90 : vector<16x128xf32>
    %92 = arith.truncf %91 : vector<16x128xf32> to vector<16x128xbf16>
    %c0_36 = arith.constant 0 : index
    %c0_37 = arith.constant 0 : index
    %93 = vector.load %arg8[%c0_36, %c0_37] : memref<8x16xbf16, #tpu.memory_space<vmem>>, vector<8x16xbf16>
    %cst_38 = arith.constant dense<0.000000e+00> : vector<8x128xf32>
    %94 = tpu.matmul %93, %92, %cst_38 {dimension_numbers = #tpu.dot_dimension_numbers<[1], [0], [0], [1], [0, 0, 1, 1], [], []>} : vector<8x16xbf16>, vector<16x128xbf16>, vector<8x128xf32> -> vector<8x128xf32>
    %95 = arith.truncf %94 : vector<8x128xf32> to vector<8x128xbf16>
    %c0_39 = arith.constant 0 : index
    %c0_40 = arith.constant 0 : index
    %96 = vector.load %arg9[%c0_39, %c0_40] : memref<128x64xbf16, #tpu.memory_space<vmem>>, vector<128x64xbf16>
    %cst_41 = arith.constant dense<0.000000e+00> : vector<8x64xf32>
    %97 = tpu.matmul %95, %96, %cst_41 {dimension_numbers = #tpu.dot_dimension_numbers<[1], [0], [0], [1], [0, 0, 1, 1], [], []>} : vector<8x128xbf16>, vector<128x64xbf16>, vector<8x64xf32> -> vector<8x64xf32>
    %98 = vector.shape_cast %97 : vector<8x64xf32> to vector<1x8x64xf32>
    %99 = arith.truncf %98 : vector<1x8x64xf32> to vector<1x8x64xbf16>
    %c0_42 = arith.constant 0 : index
    %c0_43 = arith.constant 0 : index
    %c0_44 = arith.constant 0 : index
    %100 = vector.load %arg11[%c0_42, %c0_43, %c0_44] : memref<1x8x64xbf16, #tpu.memory_space<vmem>>, vector<1x8x64xbf16>
    tpu.vector_store %arg11[%c0_42, %c0_43, %c0_44], %99 {strides = array<i32>} : memref<1x8x64xbf16, #tpu.memory_space<vmem>>, vector<1x8x64xbf16>,
    return
  }
  func.func @transform_0(%arg0: i32) -> (i32, i32, i32) {
    %c0_i32 = arith.constant 0 : i32
    %c0_i32_0 = arith.constant 0 : i32
    %c0_i32_1 = arith.constant 0 : i32
    return %arg0, %c0_i32, %c0_i32_0 : i32, i32, i32
  }
  func.func @transform_1(%arg0: i32) -> (i32, i32) {
    %c0_i32 = arith.constant 0 : i32
    %c0_i32_0 = arith.constant 0 : i32
    %c0_i32_1 = arith.constant 0 : i32
    return %c0_i32, %c0_i32_0 : i32, i32
  }
  func.func @transform_2(%arg0: i32) -> (i32, i32) {
    %c0_i32 = arith.constant 0 : i32
    %c0_i32_0 = arith.constant 0 : i32
    %c0_i32_1 = arith.constant 0 : i32
    return %c0_i32, %c0_i32_0 : i32, i32
  }
  func.func @transform_3(%arg0: i32) -> (i32, i32) {
    %c0_i32 = arith.constant 0 : i32
    %c0_i32_0 = arith.constant 0 : i32
    %c0_i32_1 = arith.constant 0 : i32
    return %c0_i32, %c0_i32_0 : i32, i32
  }
  func.func @transform_4(%arg0: i32) -> (i32, i32) {
    %c0_i32 = arith.constant 0 : i32
    %c0_i32_0 = arith.constant 0 : i32
    %c0_i32_1 = arith.constant 0 : i32
    return %c0_i32, %c0_i32_0 : i32, i32
  }
  func.func @transform_5(%arg0: i32) -> (i32, i32) {
    %c0_i32 = arith.constant 0 : i32
    %c0_i32_0 = arith.constant 0 : i32
    %c0_i32_1 = arith.constant 0 : i32
    return %c0_i32, %c0_i32_0 : i32, i32
  }
  func.func @transform_6(%arg0: i32) -> (i32, i32) {
    %c0_i32 = arith.constant 0 : i32
    %c0_i32_0 = arith.constant 0 : i32
    %c0_i32_1 = arith.constant 0 : i32
    return %c0_i32, %c0_i32_0 : i32, i32
  }
  func.func @transform_7(%arg0: i32) -> (i32, i32) {
    %c0_i32 = arith.constant 0 : i32
    %c0_i32_0 = arith.constant 0 : i32
    %c0_i32_1 = arith.constant 0 : i32
    return %c0_i32, %c0_i32_0 : i32, i32
  }
  func.func @transform_8(%arg0: i32) -> (i32, i32) {
    %c0_i32 = arith.constant 0 : i32
    %c0_i32_0 = arith.constant 0 : i32
    %c0_i32_1 = arith.constant 0 : i32
    return %c0_i32, %c0_i32_0 : i32, i32
  }
  func.func @transform_9(%arg0: i32) -> (i32, i32, i32) {
    %c0_i32 = arith.constant 0 : i32
    %c0_i32_0 = arith.constant 0 : i32
    %c0_i32_1 = arith.constant 0 : i32
    return %arg0, %c0_i32, %c0_i32_0 : i32, i32, i32
  }
  func.func @transform_10(%arg0: i32) -> (i32, i32, i32) {
    %c0_i32 = arith.constant 0 : i32
    %c0_i32_0 = arith.constant 0 : i32
    %c0_i32_1 = arith.constant 0 : i32
    return %arg0, %c0_i32, %c0_i32_0 : i32, i32, i32
  }
}

module attributes {stable_mosaic.version = 11 : i64} {
  func.func @_conv_chain_kernel(%arg0: i32, %arg1: memref<1x8x64xbf16, #tpu.memory_space<vmem>>, %arg2: memref<192x128xbf16, #tpu.memory_space<vmem>>, %arg3: memref<128x256xbf16, #tpu.memory_space<vmem>>, %arg4: memref<128x16xf32, #tpu.memory_space<vmem>>, %arg5: memref<256x32xf32, #tpu.memory_space<vmem>>, %arg6: memref<16x128xf32, #tpu.memory_space<vmem>>, %arg7: memref<32x256xf32, #tpu.memory_space<vmem>>, %arg8: memref<1x8x256xbf16, #tpu.memory_space<vmem>>) attributes {dimension_semantics = [#tpu.dimension_semantics<parallel>], iteration_bounds = array<i64: 2>, scalar_prefetch = 0 : i64, scratch_operands = 0 : i64, tpu.core_type = #tpu.core_type<tc>, window_params = [{transform_indices = @transform_0, window_bounds = array<i64: 1, 8, 64>}, {pipeline_mode = #tpu.pipeline_mode<synchronous>, transform_indices = @transform_1, window_bounds = array<i64: 192, 128>}, {pipeline_mode = #tpu.pipeline_mode<synchronous>, transform_indices = @transform_2, window_bounds = array<i64: 128, 256>}, {pipeline_mode = #tpu.pipeline_mode<synchronous>, transform_indices = @transform_3, window_bounds = array<i64: 128, 16>}, {pipeline_mode = #tpu.pipeline_mode<synchronous>, transform_indices = @transform_4, window_bounds = array<i64: 256, 32>}, {pipeline_mode = #tpu.pipeline_mode<synchronous>, transform_indices = @transform_5, window_bounds = array<i64: 16, 128>}, {pipeline_mode = #tpu.pipeline_mode<synchronous>, transform_indices = @transform_6, window_bounds = array<i64: 32, 256>}, {transform_indices = @transform_7, window_bounds = array<i64: 1, 8, 256>}]} {
    %c0 = arith.constant 0 : index
    %c0_0 = arith.constant 0 : index
    %c0_1 = arith.constant 0 : index
    %0 = vector.load %arg1[%c0, %c0_0, %c0_1] : memref<1x8x64xbf16, #tpu.memory_space<vmem>>, vector<1x8x64xbf16>
    %1 = vector.shape_cast %0 : vector<1x8x64xbf16> to vector<8x64xbf16>
    %cst = arith.constant 0.000000e+00 : f32
    %2 = vector.broadcast %cst : f32 to vector<8x128xf32>
    %cst_2 = arith.constant 0.000000e+00 : bf16
    %3 = vector.broadcast %cst_2 : bf16 to vector<1x64xbf16>
    %4 = tpu.concatenate %3, %1, %3 in 0 : vector<1x64xbf16>, vector<8x64xbf16>, vector<1x64xbf16> -> vector<10x64xbf16>
    %5 = vector.extract_strided_slice %4 {offsets = [0, 0], sizes = [8, 64], strides = [1, 1]} : vector<10x64xbf16> to vector<8x64xbf16>
    %6 = vector.extract_strided_slice %4 {offsets = [1, 0], sizes = [8, 64], strides = [1, 1]} : vector<10x64xbf16> to vector<8x64xbf16>
    %7 = vector.extract_strided_slice %4 {offsets = [2, 0], sizes = [8, 64], strides = [1, 1]} : vector<10x64xbf16> to vector<8x64xbf16>
    %8 = tpu.concatenate %5, %6, %7 in 1 : vector<8x64xbf16>, vector<8x64xbf16>, vector<8x64xbf16> -> vector<8x192xbf16>
    %c0_3 = arith.constant 0 : index
    %c0_4 = arith.constant 0 : index
    %9 = vector.load %arg2[%c0_3, %c0_4] : memref<192x128xbf16, #tpu.memory_space<vmem>>, vector<192x128xbf16>
    %cst_5 = arith.constant dense<0.000000e+00> : vector<8x128xf32>
    %10 = tpu.matmul %8, %9, %cst_5 {dimension_numbers = #tpu.dot_dimension_numbers<[1], [0], [0], [1], [0, 0, 1, 1], [], []>} : vector<8x192xbf16>, vector<192x128xbf16>, vector<8x128xf32> -> vector<8x128xf32>
    %11 = arith.addf %2, %10 : vector<8x128xf32>
    %cst_6 = arith.constant dense<0.000000e+00> : vector<128xf32>
    %12 = vector.multi_reduction <add>, %11, %cst_6 [0] : vector<8x128xf32> to vector<128xf32>
    %13 = vector.shape_cast %12 : vector<128xf32> to vector<1x128xf32>
    %14 = arith.mulf %11, %11 : vector<8x128xf32>
    %cst_7 = arith.constant dense<0.000000e+00> : vector<128xf32>
    %15 = vector.multi_reduction <add>, %14, %cst_7 [0] : vector<8x128xf32> to vector<128xf32>
    %16 = vector.shape_cast %15 : vector<128xf32> to vector<1x128xf32>
    %17 = tpu.concatenate %13, %16 in 0 : vector<1x128xf32>, vector<1x128xf32> -> vector<2x128xf32>
    %c0_8 = arith.constant 0 : index
    %c0_9 = arith.constant 0 : index
    %18 = vector.load %arg4[%c0_8, %c0_9] : memref<128x16xf32, #tpu.memory_space<vmem>>, vector<128x16xf32>
    %cst_10 = arith.constant dense<0.000000e+00> : vector<2x16xf32>
    %19 = tpu.matmul %17, %18, %cst_10 {dimension_numbers = #tpu.dot_dimension_numbers<[1], [0], [0], [1], [0, 0, 1, 1], [], []>} : vector<2x128xf32>, vector<128x16xf32>, vector<2x16xf32> -> vector<2x16xf32>
    %cst_11 = arith.constant 1.562500e-02 : f32
    %20 = vector.broadcast %cst_11 : f32 to vector<2x16xf32>
    %21 = arith.mulf %19, %20 : vector<2x16xf32>
    %22 = vector.extract_strided_slice %21 {offsets = [0, 0], sizes = [1, 16], strides = [1, 1]} : vector<2x16xf32> to vector<1x16xf32>
    %23 = vector.extract_strided_slice %21 {offsets = [1, 0], sizes = [1, 16], strides = [1, 1]} : vector<2x16xf32> to vector<1x16xf32>
    %24 = arith.mulf %22, %22 : vector<1x16xf32>
    %25 = arith.subf %23, %24 : vector<1x16xf32>
    %cst_12 = arith.constant 9.99999974E-6 : f32
    %26 = vector.broadcast %cst_12 : f32 to vector<1x16xf32>
    %27 = arith.addf %25, %26 : vector<1x16xf32>
    %28 = math.rsqrt %27 : vector<1x16xf32>
    %29 = arith.mulf %22, %28 : vector<1x16xf32>
    %30 = tpu.concatenate %28, %29 in 0 : vector<1x16xf32>, vector<1x16xf32> -> vector<2x16xf32>
    %c0_13 = arith.constant 0 : index
    %c0_14 = arith.constant 0 : index
    %31 = vector.load %arg6[%c0_13, %c0_14] : memref<16x128xf32, #tpu.memory_space<vmem>>, vector<16x128xf32>
    %cst_15 = arith.constant dense<0.000000e+00> : vector<2x128xf32>
    %32 = tpu.matmul %30, %31, %cst_15 {dimension_numbers = #tpu.dot_dimension_numbers<[1], [0], [0], [1], [0, 0, 1, 1], [], []>} : vector<2x16xf32>, vector<16x128xf32>, vector<2x128xf32> -> vector<2x128xf32>
    %33 = vector.extract_strided_slice %32 {offsets = [0, 0], sizes = [1, 128], strides = [1, 1]} : vector<2x128xf32> to vector<1x128xf32>
    %34 = vector.broadcast %33 : vector<1x128xf32> to vector<8x128xf32>
    %35 = arith.mulf %11, %34 : vector<8x128xf32>
    %36 = vector.extract_strided_slice %32 {offsets = [1, 0], sizes = [1, 128], strides = [1, 1]} : vector<2x128xf32> to vector<1x128xf32>
    %37 = vector.broadcast %36 : vector<1x128xf32> to vector<8x128xf32>
    %38 = arith.subf %35, %37 : vector<8x128xf32>
    %cst_16 = arith.constant 0.000000e+00 : f32
    %39 = vector.broadcast %cst_16 : f32 to vector<8x128xf32>
    %40 = arith.maximumf %38, %39 : vector<8x128xf32>
    %41 = arith.truncf %40 : vector<8x128xf32> to vector<8x128xbf16>
    %cst_17 = arith.constant 0.000000e+00 : f32
    %42 = vector.broadcast %cst_17 : f32 to vector<8x256xf32>
    %c0_18 = arith.constant 0 : index
    %c0_19 = arith.constant 0 : index
    %43 = vector.load %arg3[%c0_18, %c0_19] : memref<128x256xbf16, #tpu.memory_space<vmem>>, vector<128x256xbf16>
    %cst_20 = arith.constant dense<0.000000e+00> : vector<8x256xf32>
    %44 = tpu.matmul %41, %43, %cst_20 {dimension_numbers = #tpu.dot_dimension_numbers<[1], [0], [0], [1], [0, 0, 1, 1], [], []>} : vector<8x128xbf16>, vector<128x256xbf16>, vector<8x256xf32> -> vector<8x256xf32>
    %45 = arith.addf %42, %44 : vector<8x256xf32>
    %cst_21 = arith.constant dense<0.000000e+00> : vector<256xf32>
    %46 = vector.multi_reduction <add>, %45, %cst_21 [0] : vector<8x256xf32> to vector<256xf32>
    %47 = vector.shape_cast %46 : vector<256xf32> to vector<1x256xf32>
    %48 = arith.mulf %45, %45 : vector<8x256xf32>
    %cst_22 = arith.constant dense<0.000000e+00> : vector<256xf32>
    %49 = vector.multi_reduction <add>, %48, %cst_22 [0] : vector<8x256xf32> to vector<256xf32>
    %50 = vector.shape_cast %49 : vector<256xf32> to vector<1x256xf32>
    %51 = tpu.concatenate %47, %50 in 0 : vector<1x256xf32>, vector<1x256xf32> -> vector<2x256xf32>
    %c0_23 = arith.constant 0 : index
    %c0_24 = arith.constant 0 : index
    %52 = vector.load %arg5[%c0_23, %c0_24] : memref<256x32xf32, #tpu.memory_space<vmem>>, vector<256x32xf32>
    %cst_25 = arith.constant dense<0.000000e+00> : vector<2x32xf32>
    %53 = tpu.matmul %51, %52, %cst_25 {dimension_numbers = #tpu.dot_dimension_numbers<[1], [0], [0], [1], [0, 0, 1, 1], [], []>} : vector<2x256xf32>, vector<256x32xf32>, vector<2x32xf32> -> vector<2x32xf32>
    %cst_26 = arith.constant 1.562500e-02 : f32
    %54 = vector.broadcast %cst_26 : f32 to vector<2x32xf32>
    %55 = arith.mulf %53, %54 : vector<2x32xf32>
    %56 = vector.extract_strided_slice %55 {offsets = [0, 0], sizes = [1, 32], strides = [1, 1]} : vector<2x32xf32> to vector<1x32xf32>
    %57 = vector.extract_strided_slice %55 {offsets = [1, 0], sizes = [1, 32], strides = [1, 1]} : vector<2x32xf32> to vector<1x32xf32>
    %58 = arith.mulf %56, %56 : vector<1x32xf32>
    %59 = arith.subf %57, %58 : vector<1x32xf32>
    %cst_27 = arith.constant 9.99999974E-6 : f32
    %60 = vector.broadcast %cst_27 : f32 to vector<1x32xf32>
    %61 = arith.addf %59, %60 : vector<1x32xf32>
    %62 = math.rsqrt %61 : vector<1x32xf32>
    %63 = arith.mulf %56, %62 : vector<1x32xf32>
    %64 = tpu.concatenate %62, %63 in 0 : vector<1x32xf32>, vector<1x32xf32> -> vector<2x32xf32>
    %c0_28 = arith.constant 0 : index
    %c0_29 = arith.constant 0 : index
    %65 = vector.load %arg7[%c0_28, %c0_29] : memref<32x256xf32, #tpu.memory_space<vmem>>, vector<32x256xf32>
    %cst_30 = arith.constant dense<0.000000e+00> : vector<2x256xf32>
    %66 = tpu.matmul %64, %65, %cst_30 {dimension_numbers = #tpu.dot_dimension_numbers<[1], [0], [0], [1], [0, 0, 1, 1], [], []>} : vector<2x32xf32>, vector<32x256xf32>, vector<2x256xf32> -> vector<2x256xf32>
    %67 = vector.extract_strided_slice %66 {offsets = [0, 0], sizes = [1, 256], strides = [1, 1]} : vector<2x256xf32> to vector<1x256xf32>
    %68 = vector.broadcast %67 : vector<1x256xf32> to vector<8x256xf32>
    %69 = arith.mulf %45, %68 : vector<8x256xf32>
    %70 = vector.extract_strided_slice %66 {offsets = [1, 0], sizes = [1, 256], strides = [1, 1]} : vector<2x256xf32> to vector<1x256xf32>
    %71 = vector.broadcast %70 : vector<1x256xf32> to vector<8x256xf32>
    %72 = arith.subf %69, %71 : vector<8x256xf32>
    %cst_31 = arith.constant 0.000000e+00 : f32
    %73 = vector.broadcast %cst_31 : f32 to vector<8x256xf32>
    %74 = arith.maximumf %72, %73 : vector<8x256xf32>
    %75 = vector.shape_cast %74 : vector<8x256xf32> to vector<1x8x256xf32>
    %76 = arith.truncf %75 : vector<1x8x256xf32> to vector<1x8x256xbf16>
    %c0_32 = arith.constant 0 : index
    %c0_33 = arith.constant 0 : index
    %c0_34 = arith.constant 0 : index
    %77 = vector.load %arg8[%c0_32, %c0_33, %c0_34] : memref<1x8x256xbf16, #tpu.memory_space<vmem>>, vector<1x8x256xbf16>
    tpu.vector_store %arg8[%c0_32, %c0_33, %c0_34], %76 {strides = array<i32>} : memref<1x8x256xbf16, #tpu.memory_space<vmem>>, vector<1x8x256xbf16>,
    return
  }
  func.func @transform_0(%arg0: i32) -> (i32, i32, i32) {
    %c0_i32 = arith.constant 0 : i32
    %c0_i32_0 = arith.constant 0 : i32
    %c0_i32_1 = arith.constant 0 : i32
    return %arg0, %c0_i32, %c0_i32_0 : i32, i32, i32
  }
  func.func @transform_1(%arg0: i32) -> (i32, i32) {
    %c0_i32 = arith.constant 0 : i32
    %c0_i32_0 = arith.constant 0 : i32
    %c0_i32_1 = arith.constant 0 : i32
    return %c0_i32, %c0_i32_0 : i32, i32
  }
  func.func @transform_2(%arg0: i32) -> (i32, i32) {
    %c0_i32 = arith.constant 0 : i32
    %c0_i32_0 = arith.constant 0 : i32
    %c0_i32_1 = arith.constant 0 : i32
    return %c0_i32, %c0_i32_0 : i32, i32
  }
  func.func @transform_3(%arg0: i32) -> (i32, i32) {
    %c0_i32 = arith.constant 0 : i32
    %c0_i32_0 = arith.constant 0 : i32
    %c0_i32_1 = arith.constant 0 : i32
    return %c0_i32, %c0_i32_0 : i32, i32
  }
  func.func @transform_4(%arg0: i32) -> (i32, i32) {
    %c0_i32 = arith.constant 0 : i32
    %c0_i32_0 = arith.constant 0 : i32
    %c0_i32_1 = arith.constant 0 : i32
    return %c0_i32, %c0_i32_0 : i32, i32
  }
  func.func @transform_5(%arg0: i32) -> (i32, i32) {
    %c0_i32 = arith.constant 0 : i32
    %c0_i32_0 = arith.constant 0 : i32
    %c0_i32_1 = arith.constant 0 : i32
    return %c0_i32, %c0_i32_0 : i32, i32
  }
  func.func @transform_6(%arg0: i32) -> (i32, i32) {
    %c0_i32 = arith.constant 0 : i32
    %c0_i32_0 = arith.constant 0 : i32
    %c0_i32_1 = arith.constant 0 : i32
    return %c0_i32, %c0_i32_0 : i32, i32
  }
  func.func @transform_7(%arg0: i32) -> (i32, i32, i32) {
    %c0_i32 = arith.constant 0 : i32
    %c0_i32_0 = arith.constant 0 : i32
    %c0_i32_1 = arith.constant 0 : i32
    return %arg0, %c0_i32, %c0_i32_0 : i32, i32, i32
  }
}

module attributes {stable_mosaic.version = 11 : i64} {
  func.func @_conv_chain_kernel(%arg0: i32, %arg1: memref<1x16x128xbf16, #tpu.memory_space<vmem>>, %arg2: memref<1x16x128xbf16, #tpu.memory_space<vmem>>, %arg3: memref<384x128xbf16, #tpu.memory_space<vmem>>, %arg4: memref<384x128xbf16, #tpu.memory_space<vmem>>, %arg5: memref<384x128xbf16, #tpu.memory_space<vmem>>, %arg6: memref<128x8xf32, #tpu.memory_space<vmem>>, %arg7: memref<128x8xf32, #tpu.memory_space<vmem>>, %arg8: memref<8x128xf32, #tpu.memory_space<vmem>>, %arg9: memref<8x128xf32, #tpu.memory_space<vmem>>, %arg10: memref<1x16x128xf32, #tpu.memory_space<vmem>>) attributes {dimension_semantics = [#tpu.dimension_semantics<parallel>], iteration_bounds = array<i64: 2>, scalar_prefetch = 0 : i64, scratch_operands = 0 : i64, tpu.core_type = #tpu.core_type<tc>, window_params = [{transform_indices = @transform_0, window_bounds = array<i64: 1, 16, 128>}, {transform_indices = @transform_1, window_bounds = array<i64: 1, 16, 128>}, {pipeline_mode = #tpu.pipeline_mode<synchronous>, transform_indices = @transform_2, window_bounds = array<i64: 384, 128>}, {pipeline_mode = #tpu.pipeline_mode<synchronous>, transform_indices = @transform_3, window_bounds = array<i64: 384, 128>}, {pipeline_mode = #tpu.pipeline_mode<synchronous>, transform_indices = @transform_4, window_bounds = array<i64: 384, 128>}, {pipeline_mode = #tpu.pipeline_mode<synchronous>, transform_indices = @transform_5, window_bounds = array<i64: 128, 8>}, {pipeline_mode = #tpu.pipeline_mode<synchronous>, transform_indices = @transform_6, window_bounds = array<i64: 128, 8>}, {pipeline_mode = #tpu.pipeline_mode<synchronous>, transform_indices = @transform_7, window_bounds = array<i64: 8, 128>}, {pipeline_mode = #tpu.pipeline_mode<synchronous>, transform_indices = @transform_8, window_bounds = array<i64: 8, 128>}, {transform_indices = @transform_9, window_bounds = array<i64: 1, 16, 128>}]} {
    %c0 = arith.constant 0 : index
    %c0_0 = arith.constant 0 : index
    %c0_1 = arith.constant 0 : index
    %0 = vector.load %arg1[%c0, %c0_0, %c0_1] : memref<1x16x128xbf16, #tpu.memory_space<vmem>>, vector<1x16x128xbf16>
    %1 = vector.shape_cast %0 : vector<1x16x128xbf16> to vector<16x128xbf16>
    %c0_2 = arith.constant 0 : index
    %c0_3 = arith.constant 0 : index
    %c0_4 = arith.constant 0 : index
    %2 = vector.load %arg2[%c0_2, %c0_3, %c0_4] : memref<1x16x128xbf16, #tpu.memory_space<vmem>>, vector<1x16x128xbf16>
    %3 = vector.shape_cast %2 : vector<1x16x128xbf16> to vector<16x128xbf16>
    %cst = arith.constant 0.000000e+00 : f32
    %4 = vector.broadcast %cst : f32 to vector<16x128xf32>
    %cst_5 = arith.constant 0.000000e+00 : bf16
    %5 = vector.broadcast %cst_5 : bf16 to vector<1x128xbf16>
    %6 = tpu.concatenate %5, %1, %5 in 0 : vector<1x128xbf16>, vector<16x128xbf16>, vector<1x128xbf16> -> vector<18x128xbf16>
    %7 = vector.extract_strided_slice %6 {offsets = [0, 0], sizes = [16, 128], strides = [1, 1]} : vector<18x128xbf16> to vector<16x128xbf16>
    %8 = vector.extract_strided_slice %6 {offsets = [1, 0], sizes = [16, 128], strides = [1, 1]} : vector<18x128xbf16> to vector<16x128xbf16>
    %9 = vector.extract_strided_slice %6 {offsets = [2, 0], sizes = [16, 128], strides = [1, 1]} : vector<18x128xbf16> to vector<16x128xbf16>
    %10 = tpu.concatenate %7, %8, %9 in 1 : vector<16x128xbf16>, vector<16x128xbf16>, vector<16x128xbf16> -> vector<16x384xbf16>
    %c0_6 = arith.constant 0 : index
    %c0_7 = arith.constant 0 : index
    %11 = vector.load %arg3[%c0_6, %c0_7] : memref<384x128xbf16, #tpu.memory_space<vmem>>, vector<384x128xbf16>
    %cst_8 = arith.constant dense<0.000000e+00> : vector<16x128xf32>
    %12 = tpu.matmul %10, %11, %cst_8 {dimension_numbers = #tpu.dot_dimension_numbers<[1], [0], [0], [1], [0, 0, 1, 1], [], []>} : vector<16x384xbf16>, vector<384x128xbf16>, vector<16x128xf32> -> vector<16x128xf32>
    %13 = arith.addf %4, %12 : vector<16x128xf32>
    %cst_9 = arith.constant 0.000000e+00 : bf16
    %14 = vector.broadcast %cst_9 : bf16 to vector<1x128xbf16>
    %15 = tpu.concatenate %14, %3, %14 in 0 : vector<1x128xbf16>, vector<16x128xbf16>, vector<1x128xbf16> -> vector<18x128xbf16>
    %16 = vector.extract_strided_slice %15 {offsets = [0, 0], sizes = [16, 128], strides = [1, 1]} : vector<18x128xbf16> to vector<16x128xbf16>
    %17 = vector.extract_strided_slice %15 {offsets = [1, 0], sizes = [16, 128], strides = [1, 1]} : vector<18x128xbf16> to vector<16x128xbf16>
    %18 = vector.extract_strided_slice %15 {offsets = [2, 0], sizes = [16, 128], strides = [1, 1]} : vector<18x128xbf16> to vector<16x128xbf16>
    %19 = tpu.concatenate %16, %17, %18 in 1 : vector<16x128xbf16>, vector<16x128xbf16>, vector<16x128xbf16> -> vector<16x384xbf16>
    %c0_10 = arith.constant 0 : index
    %c0_11 = arith.constant 0 : index
    %20 = vector.load %arg4[%c0_10, %c0_11] : memref<384x128xbf16, #tpu.memory_space<vmem>>, vector<384x128xbf16>
    %cst_12 = arith.constant dense<0.000000e+00> : vector<16x128xf32>
    %21 = tpu.matmul %19, %20, %cst_12 {dimension_numbers = #tpu.dot_dimension_numbers<[1], [0], [0], [1], [0, 0, 1, 1], [], []>} : vector<16x384xbf16>, vector<384x128xbf16>, vector<16x128xf32> -> vector<16x128xf32>
    %22 = arith.addf %13, %21 : vector<16x128xf32>
    %cst_13 = arith.constant dense<0.000000e+00> : vector<128xf32>
    %23 = vector.multi_reduction <add>, %22, %cst_13 [0] : vector<16x128xf32> to vector<128xf32>
    %24 = vector.shape_cast %23 : vector<128xf32> to vector<1x128xf32>
    %25 = arith.mulf %22, %22 : vector<16x128xf32>
    %cst_14 = arith.constant dense<0.000000e+00> : vector<128xf32>
    %26 = vector.multi_reduction <add>, %25, %cst_14 [0] : vector<16x128xf32> to vector<128xf32>
    %27 = vector.shape_cast %26 : vector<128xf32> to vector<1x128xf32>
    %28 = tpu.concatenate %24, %27 in 0 : vector<1x128xf32>, vector<1x128xf32> -> vector<2x128xf32>
    %c0_15 = arith.constant 0 : index
    %c0_16 = arith.constant 0 : index
    %29 = vector.load %arg6[%c0_15, %c0_16] : memref<128x8xf32, #tpu.memory_space<vmem>>, vector<128x8xf32>
    %cst_17 = arith.constant dense<0.000000e+00> : vector<2x8xf32>
    %30 = tpu.matmul %28, %29, %cst_17 {dimension_numbers = #tpu.dot_dimension_numbers<[1], [0], [0], [1], [0, 0, 1, 1], [], []>} : vector<2x128xf32>, vector<128x8xf32>, vector<2x8xf32> -> vector<2x8xf32>
    %cst_18 = arith.constant 3.906250e-03 : f32
    %31 = vector.broadcast %cst_18 : f32 to vector<2x8xf32>
    %32 = arith.mulf %30, %31 : vector<2x8xf32>
    %33 = vector.extract_strided_slice %32 {offsets = [0, 0], sizes = [1, 8], strides = [1, 1]} : vector<2x8xf32> to vector<1x8xf32>
    %34 = vector.extract_strided_slice %32 {offsets = [1, 0], sizes = [1, 8], strides = [1, 1]} : vector<2x8xf32> to vector<1x8xf32>
    %35 = arith.mulf %33, %33 : vector<1x8xf32>
    %36 = arith.subf %34, %35 : vector<1x8xf32>
    %cst_19 = arith.constant 9.99999974E-6 : f32
    %37 = vector.broadcast %cst_19 : f32 to vector<1x8xf32>
    %38 = arith.addf %36, %37 : vector<1x8xf32>
    %39 = math.rsqrt %38 : vector<1x8xf32>
    %40 = arith.mulf %33, %39 : vector<1x8xf32>
    %41 = tpu.concatenate %39, %40 in 0 : vector<1x8xf32>, vector<1x8xf32> -> vector<2x8xf32>
    %c0_20 = arith.constant 0 : index
    %c0_21 = arith.constant 0 : index
    %42 = vector.load %arg8[%c0_20, %c0_21] : memref<8x128xf32, #tpu.memory_space<vmem>>, vector<8x128xf32>
    %cst_22 = arith.constant dense<0.000000e+00> : vector<2x128xf32>
    %43 = tpu.matmul %41, %42, %cst_22 {dimension_numbers = #tpu.dot_dimension_numbers<[1], [0], [0], [1], [0, 0, 1, 1], [], []>} : vector<2x8xf32>, vector<8x128xf32>, vector<2x128xf32> -> vector<2x128xf32>
    %44 = vector.extract_strided_slice %43 {offsets = [0, 0], sizes = [1, 128], strides = [1, 1]} : vector<2x128xf32> to vector<1x128xf32>
    %45 = vector.broadcast %44 : vector<1x128xf32> to vector<16x128xf32>
    %46 = arith.mulf %22, %45 : vector<16x128xf32>
    %47 = vector.extract_strided_slice %43 {offsets = [1, 0], sizes = [1, 128], strides = [1, 1]} : vector<2x128xf32> to vector<1x128xf32>
    %48 = vector.broadcast %47 : vector<1x128xf32> to vector<16x128xf32>
    %49 = arith.subf %46, %48 : vector<16x128xf32>
    %cst_23 = arith.constant 0.000000e+00 : f32
    %50 = vector.broadcast %cst_23 : f32 to vector<16x128xf32>
    %51 = arith.maximumf %49, %50 : vector<16x128xf32>
    %52 = arith.truncf %51 : vector<16x128xf32> to vector<16x128xbf16>
    %cst_24 = arith.constant 0.000000e+00 : f32
    %53 = vector.broadcast %cst_24 : f32 to vector<16x128xf32>
    %cst_25 = arith.constant 0.000000e+00 : bf16
    %54 = vector.broadcast %cst_25 : bf16 to vector<1x128xbf16>
    %55 = tpu.concatenate %54, %52, %54 in 0 : vector<1x128xbf16>, vector<16x128xbf16>, vector<1x128xbf16> -> vector<18x128xbf16>
    %56 = vector.extract_strided_slice %55 {offsets = [0, 0], sizes = [16, 128], strides = [1, 1]} : vector<18x128xbf16> to vector<16x128xbf16>
    %57 = vector.extract_strided_slice %55 {offsets = [1, 0], sizes = [16, 128], strides = [1, 1]} : vector<18x128xbf16> to vector<16x128xbf16>
    %58 = vector.extract_strided_slice %55 {offsets = [2, 0], sizes = [16, 128], strides = [1, 1]} : vector<18x128xbf16> to vector<16x128xbf16>
    %59 = tpu.concatenate %56, %57, %58 in 1 : vector<16x128xbf16>, vector<16x128xbf16>, vector<16x128xbf16> -> vector<16x384xbf16>
    %c0_26 = arith.constant 0 : index
    %c0_27 = arith.constant 0 : index
    %60 = vector.load %arg5[%c0_26, %c0_27] : memref<384x128xbf16, #tpu.memory_space<vmem>>, vector<384x128xbf16>
    %cst_28 = arith.constant dense<0.000000e+00> : vector<16x128xf32>
    %61 = tpu.matmul %59, %60, %cst_28 {dimension_numbers = #tpu.dot_dimension_numbers<[1], [0], [0], [1], [0, 0, 1, 1], [], []>} : vector<16x384xbf16>, vector<384x128xbf16>, vector<16x128xf32> -> vector<16x128xf32>
    %62 = arith.addf %53, %61 : vector<16x128xf32>
    %cst_29 = arith.constant dense<0.000000e+00> : vector<128xf32>
    %63 = vector.multi_reduction <add>, %62, %cst_29 [0] : vector<16x128xf32> to vector<128xf32>
    %64 = vector.shape_cast %63 : vector<128xf32> to vector<1x128xf32>
    %65 = arith.mulf %62, %62 : vector<16x128xf32>
    %cst_30 = arith.constant dense<0.000000e+00> : vector<128xf32>
    %66 = vector.multi_reduction <add>, %65, %cst_30 [0] : vector<16x128xf32> to vector<128xf32>
    %67 = vector.shape_cast %66 : vector<128xf32> to vector<1x128xf32>
    %68 = tpu.concatenate %64, %67 in 0 : vector<1x128xf32>, vector<1x128xf32> -> vector<2x128xf32>
    %c0_31 = arith.constant 0 : index
    %c0_32 = arith.constant 0 : index
    %69 = vector.load %arg7[%c0_31, %c0_32] : memref<128x8xf32, #tpu.memory_space<vmem>>, vector<128x8xf32>
    %cst_33 = arith.constant dense<0.000000e+00> : vector<2x8xf32>
    %70 = tpu.matmul %68, %69, %cst_33 {dimension_numbers = #tpu.dot_dimension_numbers<[1], [0], [0], [1], [0, 0, 1, 1], [], []>} : vector<2x128xf32>, vector<128x8xf32>, vector<2x8xf32> -> vector<2x8xf32>
    %cst_34 = arith.constant 3.906250e-03 : f32
    %71 = vector.broadcast %cst_34 : f32 to vector<2x8xf32>
    %72 = arith.mulf %70, %71 : vector<2x8xf32>
    %73 = vector.extract_strided_slice %72 {offsets = [0, 0], sizes = [1, 8], strides = [1, 1]} : vector<2x8xf32> to vector<1x8xf32>
    %74 = vector.extract_strided_slice %72 {offsets = [1, 0], sizes = [1, 8], strides = [1, 1]} : vector<2x8xf32> to vector<1x8xf32>
    %75 = arith.mulf %73, %73 : vector<1x8xf32>
    %76 = arith.subf %74, %75 : vector<1x8xf32>
    %cst_35 = arith.constant 9.99999974E-6 : f32
    %77 = vector.broadcast %cst_35 : f32 to vector<1x8xf32>
    %78 = arith.addf %76, %77 : vector<1x8xf32>
    %79 = math.rsqrt %78 : vector<1x8xf32>
    %80 = arith.mulf %73, %79 : vector<1x8xf32>
    %81 = tpu.concatenate %79, %80 in 0 : vector<1x8xf32>, vector<1x8xf32> -> vector<2x8xf32>
    %c0_36 = arith.constant 0 : index
    %c0_37 = arith.constant 0 : index
    %82 = vector.load %arg9[%c0_36, %c0_37] : memref<8x128xf32, #tpu.memory_space<vmem>>, vector<8x128xf32>
    %cst_38 = arith.constant dense<0.000000e+00> : vector<2x128xf32>
    %83 = tpu.matmul %81, %82, %cst_38 {dimension_numbers = #tpu.dot_dimension_numbers<[1], [0], [0], [1], [0, 0, 1, 1], [], []>} : vector<2x8xf32>, vector<8x128xf32>, vector<2x128xf32> -> vector<2x128xf32>
    %84 = vector.extract_strided_slice %83 {offsets = [0, 0], sizes = [1, 128], strides = [1, 1]} : vector<2x128xf32> to vector<1x128xf32>
    %85 = vector.broadcast %84 : vector<1x128xf32> to vector<16x128xf32>
    %86 = arith.mulf %62, %85 : vector<16x128xf32>
    %87 = vector.extract_strided_slice %83 {offsets = [1, 0], sizes = [1, 128], strides = [1, 1]} : vector<2x128xf32> to vector<1x128xf32>
    %88 = vector.broadcast %87 : vector<1x128xf32> to vector<16x128xf32>
    %89 = arith.subf %86, %88 : vector<16x128xf32>
    %cst_39 = arith.constant 0.000000e+00 : f32
    %90 = vector.broadcast %cst_39 : f32 to vector<16x128xf32>
    %91 = arith.maximumf %89, %90 : vector<16x128xf32>
    %92 = vector.shape_cast %91 : vector<16x128xf32> to vector<1x16x128xf32>
    %c0_40 = arith.constant 0 : index
    %c0_41 = arith.constant 0 : index
    %c0_42 = arith.constant 0 : index
    %93 = vector.load %arg10[%c0_40, %c0_41, %c0_42] : memref<1x16x128xf32, #tpu.memory_space<vmem>>, vector<1x16x128xf32>
    tpu.vector_store %arg10[%c0_40, %c0_41, %c0_42], %92 {strides = array<i32>} : memref<1x16x128xf32, #tpu.memory_space<vmem>>, vector<1x16x128xf32>,
    return
  }
  func.func @transform_0(%arg0: i32) -> (i32, i32, i32) {
    %c0_i32 = arith.constant 0 : i32
    %c0_i32_0 = arith.constant 0 : i32
    %c0_i32_1 = arith.constant 0 : i32
    return %arg0, %c0_i32, %c0_i32_0 : i32, i32, i32
  }
  func.func @transform_1(%arg0: i32) -> (i32, i32, i32) {
    %c0_i32 = arith.constant 0 : i32
    %c0_i32_0 = arith.constant 0 : i32
    %c0_i32_1 = arith.constant 0 : i32
    return %arg0, %c0_i32, %c0_i32_0 : i32, i32, i32
  }
  func.func @transform_2(%arg0: i32) -> (i32, i32) {
    %c0_i32 = arith.constant 0 : i32
    %c0_i32_0 = arith.constant 0 : i32
    %c0_i32_1 = arith.constant 0 : i32
    return %c0_i32, %c0_i32_0 : i32, i32
  }
  func.func @transform_3(%arg0: i32) -> (i32, i32) {
    %c0_i32 = arith.constant 0 : i32
    %c0_i32_0 = arith.constant 0 : i32
    %c0_i32_1 = arith.constant 0 : i32
    return %c0_i32, %c0_i32_0 : i32, i32
  }
  func.func @transform_4(%arg0: i32) -> (i32, i32) {
    %c0_i32 = arith.constant 0 : i32
    %c0_i32_0 = arith.constant 0 : i32
    %c0_i32_1 = arith.constant 0 : i32
    return %c0_i32, %c0_i32_0 : i32, i32
  }
  func.func @transform_5(%arg0: i32) -> (i32, i32) {
    %c0_i32 = arith.constant 0 : i32
    %c0_i32_0 = arith.constant 0 : i32
    %c0_i32_1 = arith.constant 0 : i32
    return %c0_i32, %c0_i32_0 : i32, i32
  }
  func.func @transform_6(%arg0: i32) -> (i32, i32) {
    %c0_i32 = arith.constant 0 : i32
    %c0_i32_0 = arith.constant 0 : i32
    %c0_i32_1 = arith.constant 0 : i32
    return %c0_i32, %c0_i32_0 : i32, i32
  }
  func.func @transform_7(%arg0: i32) -> (i32, i32) {
    %c0_i32 = arith.constant 0 : i32
    %c0_i32_0 = arith.constant 0 : i32
    %c0_i32_1 = arith.constant 0 : i32
    return %c0_i32, %c0_i32_0 : i32, i32
  }
  func.func @transform_8(%arg0: i32) -> (i32, i32) {
    %c0_i32 = arith.constant 0 : i32
    %c0_i32_0 = arith.constant 0 : i32
    %c0_i32_1 = arith.constant 0 : i32
    return %c0_i32, %c0_i32_0 : i32, i32
  }
  func.func @transform_9(%arg0: i32) -> (i32, i32, i32) {
    %c0_i32 = arith.constant 0 : i32
    %c0_i32_0 = arith.constant 0 : i32
    %c0_i32_1 = arith.constant 0 : i32
    return %arg0, %c0_i32, %c0_i32_0 : i32, i32, i32
  }
}

</mosaic_0001>

<bundles_post_ra>
// kernel: ublock_forward.3
= control target key start
LH: loop header
LB: loop body
LE: loop exit
PB: predicated region body
PF: predicated region fallthrough
CT: control target
= control target key end

     0   :  { %s2014_s13 = smov 0   ;;  %s2391_s0 = inlined_call_operand.vmem [shape: bf16[2,16,64], index: 0, kind: input, shape index: {}]   ;;  %s2392_s1 = inlined_call_operand.vmem [shape: bf16[192,128], index: 1, kind: input, shape index: {}]   ;;  %s2393_s2 = inlined_call_operand.vmem [shape: bf16[384,128], index: 2, kind: input, shape index: {}]   ;;  %s2394_s3 = inlined_call_operand.vmem [shape: f32[128,8], index: 3, kind: input, shape index: {}, may-alias: {3,4}]   ;;  %s2395_s4 = inlined_call_operand.vmem [shape: f32[128,8], index: 4, kind: input, shape index: {}, may-alias: {3,4}]   ;;  %s2396_s5 = inlined_call_operand.vmem [shape: f32[8,128], index: 5, kind: input, shape index: {}, may-alias: {5,6}]   ;;  %s2397_s6 = inlined_call_operand.vmem [shape: f32[8,128], index: 6, kind: input, shape index: {}, may-alias: {5,6}]   ;;  %s2398_s7 = inlined_call_operand.vmem [shape: bf16[8,16], index: 7, kind: input, shape index: {}]   ;;  %s2399_s8 = inlined_call_operand.vmem [shape: bf16[128,64], index: 8, kind: input, shape index: {}]   ;;  %s2400_s9 = inlined_call_operand.vmem [shape: bf16[2,16,128], index: 9, kind: output, shape index: {0}]   ;;  %s2401_s10 = inlined_call_operand.vmem [shape: bf16[2,8,64], index: 10, kind: output, shape index: {1}]  }
   0x1 LB: > { %s1551_s14 = sadd.s32 4294967295, %s1951_s13   ;;  %p1555_p0 = scmp.ge.s32.totalorder %s1951_s13, 1  ;;  %s1951_s13 = sphi %s2014_s13, %s21_s13  }
   0x2   : > { %p315_p1 = scmp.lt.s32.totalorder %s1951_s13, 3 }
   0x4   : > { %p316_p2 = pnand %p1555_p0, %p315_p1 }
   0x5   : > { %p357_p3 = scmp.lt.s32.totalorder (!%p316_p2), %s1551_s14, 1  ;;  %v1953_v0 = vmov (!%p316_p2), 0   ;;  %v1897_v1 = vld [vmem:[%s2392_s1] sm:$0xff] (!%p316_p2)   ;;  %v1898_v2 = vld [vmem:[%s2392_s1 + $0x8] sm:$0xff] (!%p316_p2)   ;;  %vm389_vm0 = vsmask.f32 (!%p316_p2), 256 }
   0x6   : > { %319 = sbr.rel (%p316_p2) target bundleno = 2111 (0x83f), region = 56  ;;  %517 = vmatprep.subr.bf16.mxu0 (!%p316_p2), %v1953_v0  ;;  %vm388_vm1 = vcmask (!%p316_p2), 1040384   ;;  %v1899_v6 = vld [vmem:[%s2392_s1 + $0x10] sm:$0xff] (!%p316_p2)   ;;  %vm393_vm3 = vsmask.f32 (!%p316_p2), 7424  ;;  %v1900_v11 = vld [vmem:[%s2392_s1 + $0x18] sm:$0xff] (!%p316_p2)  }
   0x7   : > { %518 = vmatpush1.bf16.msra.mxu0 (!%p316_p2), %v1897_v1  ;;  %vm2043_vm2 = vmand (!%p316_p2), %vm388_vm1, %vm389_vm0  ;;  %vm410_vm4 = vcmask (!%p316_p2), 1046528   ;;  %v576_v15 = vld [vmem:[%s2394_s3] sm:$0xff] (!%p316_p2)  ;;  %v577_v16 = vld [vmem:[%s2394_s3 + $0x8] sm:$0xff] (!%p316_p2)  ;;  %vm414_vm5 = vcmask (!%p316_p2), 523264   ;;  %v1954_v20 = vmov (!%p316_p2), 0.0|0.0   ;;  %s1955_s26 = smov (!%p316_p2), 64  }
   0x8   : > { %519 = vmatprep.subr.bf16.mxu0 (!%p316_p2), %v1953_v0  ;;  %1829 = vmatprep.subr.bf16.mxu1 (!%p316_p2), %v1954_v20  ;;  %v578_v21 = vld [vmem:[%s2394_s3 + $0x10] sm:$0xff] (!%p316_p2)  ;;  %v579_v22 = vld [vmem:[%s2394_s3 + $0x18] sm:$0xff] (!%p316_p2)  ;;  %v1901_v24 = vld [vmem:[%s2392_s1 + $0x20] sm:$0xff] (!%p316_p2)   ;;  %v1830_v25 = vpack.c.bf16 (!%p316_p2), %v577_v16, %v576_v15  ;;  %vm1956_vm6 = vmmov (!%p316_p2), 0   ;;  %v1957_v57 = vmov (!%p316_p2), 0.0   ;;  %vm679_vm7 = vcmask (!%p316_p2), 64512  }
   0x9   : > { %v580_v28 = vld [vmem:[%s2394_s3 + $0x20] sm:$0xff] (!%p316_p2)  ;;  %v581_v29 = vld [vmem:[%s2394_s3 + $0x28] sm:$0xff] (!%p316_p2)  ;;  %v1833_v31 = vpack.c.bf16 (!%p316_p2), %v579_v22, %v578_v21  ;;  %v1903_v34 = vld [vmem:[%s2392_s1 + $0x30] sm:$0xff] (!%p316_p2)   ;;  %1735 = vmatprep.mubr.msk.f32.mxu1 (!%p316_p2), %vm1956_vm6, %v1957_v57  ;;  %vm1313_vm8 = vcmask (!%p316_p2), 130048   ;;  %vm1463_vm9 = vcmask (!%p316_p2), 519168  }
   0xa   : > { %v1902_v30 = vld [vmem:[%s2392_s1 + $0x28] sm:$0xff] (!%p316_p2)   ;;  %1831 = vmatpush3.bf16.msra.mxu1 (!%p316_p2), %v1830_v25  ;;  %v1836_v35 = vpack.c.bf16 (!%p316_p2), %v581_v29, %v580_v28  ;;  %v1904_v36 = vld [vmem:[%s2392_s1 + $0x38] sm:$0xff] (!%p316_p2)   ;;  %v1905_v37 = vld [vmem:[%s2392_s1 + $0x40] sm:$0xff] (!%p316_p2)  }
   0xb   : > { %520 = vmatpush1.bf16.msra.mxu0 (!%p316_p2), %v1898_v2  ;;  %1832 = vmatprep.subr.bf16.mxu1 (!%p316_p2), %v1954_v20  ;;  %v1906_v38 = vld [vmem:[%s2392_s1 + $0x48] sm:$0xff] (!%p316_p2)   ;;  %v1907_v39 = vld [vmem:[%s2392_s1 + $0x50] sm:$0xff] (!%p316_p2)   ;;  %v1908_v40 = vld [vmem:[%s2392_s1 + $0x58] sm:$0xff] (!%p316_p2)  }
   0xc   : > { %521 = vmatprep.subr.bf16.mxu0 (!%p316_p2), %v1953_v0  ;;  %v582_v43 = vld [vmem:[%s2394_s3 + $0x30] sm:$0xff] (!%p316_p2)  ;;  %v583_v44 = vld [vmem:[%s2394_s3 + $0x38] sm:$0xff] (!%p316_p2)  ;;  %v584_v46 = vld [vmem:[%s2394_s3 + $0x40] sm:$0xff] (!%p316_p2) }
   0xd   : > { %s2405_s14 = smov (!%p357_p3, %s1551_s14), 1  ;;  %v1839_v45 = vpack.c.bf16 %v583_v44, %v582_v43  ;;  %v585_v47 = vld [vmem:[%s2394_s3 + $0x48] sm:$0xff]  ;;  %v586_v49 = vld [vmem:[%s2394_s3 + $0x50] sm:$0xff]  ;;  %v587_v50 = vld [vmem:[%s2394_s3 + $0x58] sm:$0xff] }
   0xe   : > { %s1614_s17 = sshll.u32 %s2405_s14, 3  ;;  %1834 = vmatpush3.bf16.msra.mxu1 %v1833_v31  ;;  %v1842_v48 = vpack.c.bf16 %v585_v47, %v584_v46  ;;  %v1845_v51 = vpack.c.bf16 %v587_v50, %v586_v49  ;;  %v588_v52 = vld [vmem:[%s2394_s3 + $0x60] sm:$0xff]  ;;  %v589_v53 = vld [vmem:[%s2394_s3 + $0x68] sm:$0xff]  ;;  %v590_v55 = vld [vmem:[%s2394_s3 + $0x70] sm:$0xff]  ;;  %s1560_s28 = sshll.u32 %s2405_s14, 2 }
   0xf   : > { %s361_s22 = scalar_lea.vmem %s2391_s0, %s1614_s17  ;;  %522 = vmatpush1.bf16.msra.mxu0 %v1899_v6  ;;  %1835 = vmatprep.subr.bf16.mxu1 %v1954_v20  ;;  %v1848_v54 = vpack.c.bf16 %v589_v53, %v588_v52  ;;  %v591_v56 = vld [vmem:[%s2394_s3 + $0x78] sm:$0xff]  ;;  %v1911_v21 = vld [vmem:[%s2393_s2 + $0x88] sm:$0xff]   ;;  %v1914_v22 = vld [vmem:[%s2393_s2 + $0x90] sm:$0xff]  }
  0x10   : > { %v1896_v3 = vld [vmem:[%s361_s22] sm:$0xff]   ;;  %523 = vmatprep.subr.bf16.mxu0 %v1953_v0  ;;  %v1851_v58 = vpack.c.bf16 %v591_v56, %v590_v55  ;;  %v1921_v43 = vld [vmem:[%s2393_s2 + $0x18] sm:$0xff]   ;;  %v1925_v47 = vld [vmem:[%s2393_s2 + $0x68] sm:$0xff]   ;;  %v753_v55 = vlaneseq }
  0x11   : > { %v380_v4 = vshrl.u32 %v1896_v3, 16  ;;  %v383_v5 = vshll.u32 %v1896_v3, 16  ;;  %v1922_v44 = vld [vmem:[%s2393_s2 + $0x60] sm:$0xff]   ;;  %v1927_v49 = vld [vmem:[%s2393_s2 + $0x28] sm:$0xff]   ;;  %v1928_v50 = vld [vmem:[%s2393_s2 + $0x70] sm:$0xff]  }
  0x12   : > { %1837 = vmatpush3.bf16.msra.mxu1 %v1836_v35  ;;  %v1913_v35 = vld [vmem:[%s2393_s2 + $0x48] sm:$0xff]   ;;  %v1924_v46 = vld [vmem:[%s2393_s2 + $0x20] sm:$0xff]   ;;  %v1930_v52 = vld [vmem:[%s2393_s2 + $0x30] sm:$0xff]   ;;  %v2252_v56 = vshrl.u32 %v753_v55, 7 }
  0x13   : > { %v382_v7 = vrot.slane %v380_v4, 7  ;;  %524 = vmatpush1.bf16.msra.mxu0 %v1900_v11  ;;  %1838 = vmatprep.subr.bf16.mxu1 %v1954_v20  ;;  %v1931_v53 = vld [vmem:[%s2393_s2 + $0x78] sm:$0xff]  }
  0x14   : > { %525 = vmatprep.subr.bf16.mxu0 %v1953_v0 }
  0x15   : > { %v385_v9 = vor.u32 %v383_v5, %v382_v7  ;;  %v392_v10 = vsel %vm2043_vm2, %v382_v7, 0 }
  0x16   : > { %v402_v12 = vshll.u32 %v392_v10, 16  ;;  %v412_v14 = vrot.slane %v392_v10, 1  ;;  %1840 = vmatpush3.bf16.msra.mxu1 %v1839_v45  ;;  %v1923_v45 = vld [vmem:[%s2393_s2 + $0xa8] sm:$0xff]  }
  0x17   : > { %v391_v13 = vsel %vm2043_vm2, 0, %v385_v9  ;;  %526 = vmatpush1.bf16.msra.mxu0 %v1901_v24  ;;  %1841 = vmatprep.subr.bf16.mxu1 %v1954_v20 }
  0x18   : > { %v395_v17 = vshrl.u32 %v391_v13, 16  ;;  %v397_v18 = vshll.u32 %v391_v13, 16  ;;  %v411_v19 = vrot.slane %v391_v13, 1  ;;  %v404_v23 = vrot.slane %v402_v12, 1  ;;  %527 = vmatprep.subr.bf16.mxu0 %v1953_v0 }
  0x1a   : > { %v399_v26 = vrot.slane %v397_v18, 1  ;;  %v413_v27 = vsel %vm410_vm4, %v411_v19, %v412_v14  ;;  %1843 = vmatpush3.bf16.msra.mxu1 %v1842_v48  ;;  %v1909_v18 = vld [vmem:[%s2393_s2 + $0x80] sm:$0xff]   ;;  %v1926_v48 = vld [vmem:[%s2393_s2 + $0xb0] sm:$0xff]  }
  0x1b   : > { %1574 = vmatprep.mubr.msk.bf16.mxu0 %vm414_vm5, %v413_v27  ;;  %528 = vmatpush1.bf16.msra.mxu0 %v1902_v30  ;;  %v1910_v19 = vld [vmem:[%s2393_s2 + $0x40] sm:$0xff]  }
  0x1c   : > { %v400_v32 = vor.u32 %v399_v26, %v395_v17  ;;  %529 = vmatprep.subr.bf16.mxu0 %v1953_v0  ;;  %1844 = vmatprep.subr.bf16.mxu1 %v1954_v20  ;;  %v678_v17 = vld [vmem:[%s2396_s5] sm:$0xff] }
  0x1e   : > { %v405_v33 = vsel %vm393_vm3, %v400_v32, %v404_v23  ;;  %1846 = vmatpush3.bf16.msra.mxu1 %v1845_v51  ;;  %v1929_v51 = vld [vmem:[%s2393_s2 + $0xb8] sm:$0xff]  }
  0x1f   : > { %406 = vrot.lane.b32.xlu0 %v405_v33, %s1955_s26  ;;  %530 = vmatpush1.bf16.msra.mxu0 %v1903_v34  ;;  %v1912_v34 = vld [vmem:[%s2393_s2] sm:$0xff]   ;;  %s366_s26 = scalar_lea.vmem %s2400_s9, %s1614_s17  ;;  %s1958_s17 = smov 120  }
  0x20   : > { %531 = vmatprep.subr.bf16.mxu0 %v1953_v0  ;;  %1847 = vmatprep.subr.bf16.mxu1 %v1954_v20 }
  0x22   : > { %1849 = vmatpush3.bf16.msra.mxu1 %v1848_v54  ;;  %v1932_v54 = vld [vmem:[%s2393_s2 + $0x38] sm:$0xff]  }
  0x23   : > { %532 = vmatpush1.bf16.msra.mxu0 %v1904_v36  ;;  %1850 = vmatprep.subr.bf16.mxu1 %v1954_v20 }
  0x24   : > { %533 = vmatprep.subr.bf16.mxu0 %v1953_v0 }
  0x26   : > { %1852 = vmatpush3.bf16.msra.mxu1 %v1851_v58  ;;  %v755_v58 = vsub.s32 0, %v2252_v56 }
  0x27   : > { %534 = vmatpush1.bf16.msra.mxu0 %v1905_v37  ;;  %1738 = vmatprep.subr.mxu1 %v1957_v57  ;;  %v1915_v37 = vld [vmem:[%s2393_s2 + $0x8] sm:$0xff]  }
  0x28   : > { %535 = vmatprep.subr.bf16.mxu0 %v1953_v0 }
  0x2b   : > { %536 = vmatpush1.bf16.msra.mxu0 %v1906_v38  ;;  %v1916_v38 = vld [vmem:[%s2393_s2 + $0x50] sm:$0xff]  }
  0x2c   : > { %537 = vmatprep.subr.bf16.mxu0 %v1953_v0 }
  0x2f   : > { %538 = vmatpush1.bf16.msra.mxu0 %v1907_v39  ;;  %v1917_v39 = vld [vmem:[%s2393_s2 + $0x98] sm:$0xff]  }
  0x30   : > { %539 = vmatprep.subr.bf16.mxu0 %v1953_v0 }
  0x33   : > { %540 = vmatpush1.bf16.msra.mxu0 %v1908_v40  ;;  %v1918_v40 = vld [vmem:[%s2393_s2 + $0x10] sm:$0xff]  }
  0x34   : > { %1743 = vmatprep.subr.bf16.mxu0 %v1957_v57 }
  0x91   : > { %v407_v41 = vpop.permute.xlu0 %406 }
  0x92   : > { %v416_v42 = vsel %vm414_vm5, %v391_v13, %v407_v41  ;;  %v1919_v41 = vld [vmem:[%s2393_s2 + $0x58] sm:$0xff]  }
  0x93   : > { %550 = vmatmul.mubr.bf16.vlgmr.msra.gmra.mrb[0].mxu0 %v416_v42  ;;  %v1920_v42 = vld [vmem:[%s2393_s2 + $0xa0] sm:$0xff]  }
  0x94   : > { %1759 = vmatprep.mubr.msk.bf16.mxu0 %vm1956_vm6, %v1957_v57  ;;  %1744 = vmatpush3.bf16.msra.mxu0 %v1909_v18 }
  0x95   : > { %1745 = vmatprep.subr.bf16.mxu0 %v1957_v57 }
  0x98   : > { %1746 = vmatpush3.bf16.msra.mxu0 %v1911_v21 }
  0x99   : > { %1747 = vmatprep.subr.bf16.mxu0 %v1957_v57 }
  0x9c   : > { %1748 = vmatpush3.bf16.msra.mxu0 %v1914_v22  ;;  %v1089_v22 = vld [vmem:[%s2395_s4] sm:$0xff] }
  0x9d   : > { %1749 = vmatprep.subr.bf16.mxu0 %v1957_v57 }
  0xa0   : > { %1750 = vmatpush3.bf16.msra.mxu0 %v1917_v39  ;;  %v1099_v39 = vld [vmem:[%s2395_s4 + $0x50] sm:$0xff] }
  0xa1   : > { %1751 = vmatprep.subr.bf16.mxu0 %v1957_v57 }
  0xa4   : > { %1752 = vmatpush3.bf16.msra.mxu0 %v1920_v42  ;;  %v1101_v42 = vld [vmem:[%s2395_s4 + $0x60] sm:$0xff] }
  0xa5   : > { %1753 = vmatprep.subr.bf16.mxu0 %v1957_v57 }
  0xa8   : > { %1754 = vmatpush3.bf16.msra.mxu0 %v1923_v45  ;;  %v1103_v45 = vld [vmem:[%s2395_s4 + $0x70] sm:$0xff] }
  0xa9   : > { %1755 = vmatprep.subr.bf16.mxu0 %v1957_v57 }
  0xac   : > { %1756 = vmatpush3.bf16.msra.mxu0 %v1926_v48 }
  0xad   : > { %1757 = vmatprep.subr.bf16.mxu0 %v1957_v57 }
  0xb0   : > { %1758 = vmatpush3.bf16.msra.mxu0 %v1929_v51 }
  0xb1   : > { %1809 = vmatprep.subr.bf16.mxu0 %v1957_v57 }
 0x166   : > { %v2153_v59 = vpop.f32.mrb[0].mxu0 }
 0x167   : > { %v553_v60 = vpop.f32.mrb[1].mxu0  ;;  %v565_v62 = vmul.f32 %v2153_v59, %v2153_v59 }
 0x168   : > { %v2155_v61 = vpop.f32.mrb[2].mxu0  ;;  %v761_v60 = vsub.s32 1, %v2252_v56 }
 0x169   : > { %v558_v63 = vadd.f32 %v2155_v61, %v2153_v59  ;;  %v566_v0 = vmul.f32 %v2155_v61, %v2155_v61  ;;  %v556_v1 = vpop.f32.mrb[3].mxu0 }
 0x16b   : > { %v559_v2 = vrot.slane %v558_v63, 4  ;;  %v567_v3 = vadd.f32 %v566_v0, %v565_v62 }
 0x16d   : > { %v560_v4 = vadd.f32 %v559_v2, %v558_v63  ;;  %v568_v5 = vrot.slane %v567_v3, 4 }
 0x16f   : > { %v561_v6 = vrot.slane %v560_v4, 2  ;;  %v569_v7 = vadd.f32 %v568_v5, %v567_v3 }
 0x171   : > { %v562_v9 = vadd.f32 %v561_v6, %v560_v4  ;;  %v570_v10 = vrot.slane %v569_v7, 2 }
 0x173   : > { %v563_v11 = vrot.slane %v562_v9, 1  ;;  %v571_v12 = vadd.f32 %v570_v10, %v569_v7 }
 0x175   : > { %v572_v13 = vrot.slane %v571_v12, 1  ;;  %v564_v14 = vadd.f32 %v563_v11, %v562_v9 }
 0x177   : > { %v573_v15 = vadd.f32 %v572_v13, %v571_v12 }
 0x179   : > { %v575_v16 = vsel %vm388_vm1, %v564_v14, %v573_v15 }
 0x17a   : > { %1736 = vmatmul.mubr.f32.vlgmr.msra.gmra.mrb[0].mxu1 %v575_v16 }
 0x17b   : > { %1740 = vmatprep.mubr.msk.f32.mxu1 %vm1956_vm6, %v1957_v57  ;;  %1739 = vmatpush3.msra.mxu1 %v678_v17 }
 0x17c   : > { %1642 = vmatprep.subr.bf16.mxu1 %v1910_v19 }
 0x24d   : > { %v658_v23 = vpop.f32.mrb[0].mxu1 }
 0x24e   : > { %v662_v24 = vmul.f32 0.00390625, %v658_v23  ;;  %v1737_v25 = vpop.f32.mrb[1].mxu1  ;;  %v1090_v23 = vld [vmem:[%s2395_s4 + $0x8] sm:$0xff] }
 0x24f   : > { %v1854_v25 = vpack.c.bf16 %v1090_v23, %v1089_v22 }
 0x250   : > { %v663_v26 = vmul.f32 %v662_v24, %v662_v24 }
 0x252   : > { %v665_v27 = vrot.slane %v663_v26, 7 }
 0x254   : > { %v667_v28 = vsub.f32 %v662_v24, %v665_v27  ;;  %v1091_v27 = vld [vmem:[%s2395_s4 + $0x10] sm:$0xff] }
 0x256   : > { %v668_v29 = vadd.f32 1e-05, %v667_v28  ;;  %v1092_v28 = vld [vmem:[%s2395_s4 + $0x18] sm:$0xff] }
 0x258   : > { %1941 = vrsqrt.f32 %v668_v29  ;;  %v1857_v29 = vpack.c.bf16 %v1092_v28, %v1091_v27 }
 0x262   : > { %v1942_v30 = vpop.eup %1941 }
 0x263   : > { %v671_v31 = vrot.slane %v1942_v30, 1  ;;  %v1093_v30 = vld [vmem:[%s2395_s4 + $0x20] sm:$0xff] }
 0x265   : > { %v673_v32 = vmul.f32 %v671_v31, %v662_v24 }
 0x267   : > { %v675_v33 = vrot.slane %v673_v32, 7 }
 0x269   : > { %v677_v36 = vsel %vm388_vm1, %v671_v31, %v675_v33  ;;  %v1094_v31 = vld [vmem:[%s2395_s4 + $0x28] sm:$0xff]  ;;  %v1095_v33 = vld [vmem:[%s2395_s4 + $0x30] sm:$0xff] }
 0x26a   : > { %1741 = vmatmul.mubr.msk.f32.vlgmr.msra.gmra.mrb[2].mxu1 %vm679_vm7, %v677_v36  ;;  %v1860_v32 = vpack.c.bf16 %v1094_v31, %v1093_v30  ;;  %v1097_v36 = vld [vmem:[%s2395_s4 + $0x40] sm:$0xff] }
 0x26b   : > { %1643 = vmatpush3.bf16.msra.mxu1 %v1912_v34  ;;  %v1096_v34 = vld [vmem:[%s2395_s4 + $0x38] sm:$0xff] }
 0x26c   : > { %1644 = vmatprep.subr.bf16.mxu1 %v1913_v35  ;;  %v1863_v35 = vpack.c.bf16 %v1096_v34, %v1095_v33 }
 0x26f   : > { %1645 = vmatpush3.bf16.msra.mxu1 %v1915_v37  ;;  %v1098_v37 = vld [vmem:[%s2395_s4 + $0x48] sm:$0xff] }
 0x270   : > { %1646 = vmatprep.subr.bf16.mxu1 %v1916_v38  ;;  %v1866_v38 = vpack.c.bf16 %v1098_v37, %v1097_v36 }
 0x273   : > { %1647 = vmatpush3.bf16.msra.mxu1 %v1918_v40  ;;  %v1100_v40 = vld [vmem:[%s2395_s4 + $0x58] sm:$0xff] }
 0x274   : > { %1648 = vmatprep.subr.bf16.mxu1 %v1919_v41  ;;  %v1869_v41 = vpack.c.bf16 %v1100_v40, %v1099_v39 }
 0x277   : > { %1649 = vmatpush3.bf16.msra.mxu1 %v1921_v43  ;;  %v1102_v43 = vld [vmem:[%s2395_s4 + $0x68] sm:$0xff] }
 0x278   : > { %1650 = vmatprep.subr.bf16.mxu1 %v1922_v44  ;;  %v1872_v44 = vpack.c.bf16 %v1102_v43, %v1101_v42 }
 0x27b   : > { %1651 = vmatpush3.bf16.msra.mxu1 %v1924_v46  ;;  %v1104_v46 = vld [vmem:[%s2395_s4 + $0x78] sm:$0xff] }
 0x27c   : > { %1652 = vmatprep.subr.bf16.mxu1 %v1925_v47  ;;  %v1875_v47 = vpack.c.bf16 %v1104_v46, %v1103_v45  ;;  %v1934_v46 = vld [vmem:[%s2399_s8 + $0x8] sm:$0xff]  }
 0x27f   : > { %1653 = vmatpush3.bf16.msra.mxu1 %v1927_v49 }
 0x280   : > { %1654 = vmatprep.subr.bf16.mxu1 %v1928_v50 }
 0x283   : > { %1655 = vmatpush3.bf16.msra.mxu1 %v1930_v52 }
 0x284   : > { %1656 = vmatprep.subr.bf16.mxu1 %v1931_v53 }
 0x287   : > { %1657 = vmatpush3.bf16.msra.mxu1 %v1932_v54 }
 0x288   : > { %1853 = vmatprep.subr.bf16.mxu1 %v1954_v20 }
 0x33d   : > { %v749_v62 = vpop.f32.mrb[2].mxu1 }
 0x33e   : > { %v756_v63 = vrot.slane %v749_v62, %v755_v58  ;;  %v1742_v0 = vpop.f32.mrb[3].mxu1  ;;  %v762_v3 = vrot.slane %v749_v62, %v761_v60 }
 0x340   : > { %v757_v1 = vmul.f32 %v756_v63, %v2153_v59  ;;  %v758_v2 = vmul.f32 %v756_v63, %v2155_v61 }
 0x342   : > { %v763_v4 = vsub.f32 %v757_v1, %v762_v3  ;;  %v764_v5 = vsub.f32 %v758_v2, %v762_v3 }
 0x344   : > { %v765_v6 = vmax.f32 %v763_v4, 0.0  ;;  %v766_v7 = vmax.f32 %v764_v5, 0.0 }
 0x346   : > { %v767_v9 = vpack.c.bf16 %v766_v7, %v765_v6 }
 0x348   : > { %v769_v10 = vshrl.u32 %v767_v9, 16  ;;  %v772_v12 = vshll.u32 %v767_v9, 16 }
 0x34a   : > { %v771_v11 = vrot.slane %v769_v10, 7 }
 0x34c   : > { %v774_v13 = vor.u32 %v772_v12, %v771_v11  ;;  %v778_v14 = vsel %vm2043_vm2, %v771_v11, 0 }
 0x34d   : > { %v795_v61 = vrot.slane %v778_v14, 1  ;;  %v787_v17 = vshll.u32 %v778_v14, 16 }
 0x34e   : > { %v777_v59 = vsel %vm2043_vm2, 0, %v774_v13 }
 0x34f   : > { %v794_v15 = vrot.slane %v777_v59, 1  ;;  %v782_v16 = vshll.u32 %v777_v59, 16  ;;  %v780_v19 = vshrl.u32 %v777_v59, 16  ;;  %v789_v8 = vrot.slane %v787_v17, 1  ;;  %v1191_v17 = vld [vmem:[%s2397_s6] sm:$0xff] }
 0x351   : > { %v796_v18 = vsel %vm410_vm4, %v794_v15, %v795_v61  ;;  %v784_v21 = vrot.slane %v782_v16, 1 }
 0x352   : > { %1760 = vmatmul.mubr.bf16.vlgmr.msra.gmra.mrb[4].mxu0 %v796_v18 }
 0x353   : > { %v785_v24 = vor.u32 %v784_v21, %v780_v19  ;;  %1825 = vmatprep.mubr.msk.bf16.mxu0 %vm1956_vm6, %v1957_v57 }
 0x355   : > { %v790_v26 = vsel %vm393_vm3, %v785_v24, %v789_v8 }
 0x356   : > { %1022 = vmatprep.mubr.bf16.mxu1 %v790_v26 }
 0x357   : > { %1023 = vmatmul.mubr.bf16.vlgmr.msra.gmra.mrb[4].mxu1 %v777_v59 }
 0x358   : > { %1855 = vmatpush3.bf16.msra.mxu1 %v1854_v25  ;;  %1795 = vmatprep.mubr.msk.f32.mxu1 %vm1956_vm6, %v1957_v57 }
 0x359   : > { %1856 = vmatprep.subr.bf16.mxu1 %v1954_v20 }
 0x35c   : > { %1858 = vmatpush3.bf16.msra.mxu1 %v1857_v29 }
 0x35d   : > { %1859 = vmatprep.subr.bf16.mxu1 %v1954_v20 }
 0x360   : > { %1861 = vmatpush3.bf16.msra.mxu1 %v1860_v32 }
 0x361   : > { %1862 = vmatprep.subr.bf16.mxu1 %v1954_v20 }
 0x364   : > { %1864 = vmatpush3.bf16.msra.mxu1 %v1863_v35 }
 0x365   : > { %1865 = vmatprep.subr.bf16.mxu1 %v1954_v20 }
 0x368   : > { %1867 = vmatpush3.bf16.msra.mxu1 %v1866_v38 }
 0x369   : > { %1868 = vmatprep.subr.bf16.mxu1 %v1954_v20 }
 0x36c   : > { %1870 = vmatpush3.bf16.msra.mxu1 %v1869_v41 }
 0x36d   : > { %1871 = vmatprep.subr.bf16.mxu1 %v1954_v20 }
 0x370   : > { %1873 = vmatpush3.bf16.msra.mxu1 %v1872_v44 }
 0x371   : > { %1874 = vmatprep.subr.bf16.mxu1 %v1954_v20 }
 0x374   : > { %1876 = vmatpush3.bf16.msra.mxu1 %v1875_v47  ;;  %v1935_v47 = vld [vmem:[%s2399_s8 + $0x10] sm:$0xff]  }
 0x375   : > { %1798 = vmatprep.subr.mxu1 %v1957_v57 }
 0x425   : > { %v1065_v48 = vpop.f32.mrb[4].mxu0 }
 0x426   : > { %v1761_v49 = vpop.f32.mrb[5].mxu0 }
 0x427   : > { %v1068_v50 = vpop.f32.mrb[6].mxu0  ;;  %v1937_v49 = vld [vmem:[%s2399_s8 + $0x20] sm:$0xff]  }
 0x428   : > { %v1762_v51 = vpop.f32.mrb[7].mxu0 }
 0x429   : > { %v1939_v51 = vld [vmem:[%s2399_s8 + $0x30] sm:$0xff]  }
 0x42a   : > { %v1658_v52 = vpop.f32.mrb[4].mxu1 }
 0x42b   : > { %v1659_v53 = vpop.f32.mrb[5].mxu1 }
 0x42c   : > { %v1660_v54 = vadd.f32 %v1659_v53, %v1658_v52  ;;  %v1661_v55 = vpop.f32.mrb[6].mxu1 }
 0x42d   : > { %v1662_v62 = vpop.f32.mrb[7].mxu1 }
 0x42e   : > { %v1066_v63 = vadd.f32 %v1660_v54, %v1065_v48  ;;  %v1663_v0 = vadd.f32 %v1662_v62, %v1661_v55  ;;  %v1936_v48 = vld [vmem:[%s2399_s8 + $0x18] sm:$0xff]  }
 0x430   : > { %v1069_v1 = vadd.f32 %v1663_v0, %v1068_v50  ;;  %v1079_v2 = vmul.f32 %v1066_v63, %v1066_v63  ;;  %v1938_v50 = vld [vmem:[%s2399_s8 + $0x28] sm:$0xff]   ;;  %v1312_v0 = vld [vmem:[%s2398_s7] sm:$0xf] }
 0x432   : > { %v1072_v3 = vadd.f32 %v1069_v1, %v1066_v63  ;;  %v1080_v4 = vmul.f32 %v1069_v1, %v1069_v1 }
 0x434   : > { %v1073_v5 = vrot.slane %v1072_v3, 4  ;;  %v1081_v20 = vadd.f32 %v1080_v4, %v1079_v2 }
 0x436   : > { %v1074_v6 = vadd.f32 %v1073_v5, %v1072_v3  ;;  %v1082_v7 = vrot.slane %v1081_v20, 4 }
 0x438   : > { %v1075_v9 = vrot.slane %v1074_v6, 2  ;;  %v1083_v10 = vadd.f32 %v1082_v7, %v1081_v20 }
 0x43a   : > { %v1076_v11 = vadd.f32 %v1075_v9, %v1074_v6  ;;  %v1084_v12 = vrot.slane %v1083_v10, 2 }
 0x43c   : > { %v1077_v13 = vrot.slane %v1076_v11, 1  ;;  %v1085_v14 = vadd.f32 %v1084_v12, %v1083_v10 }
 0x43e   : > { %v1086_v59 = vrot.slane %v1085_v14, 1  ;;  %v1078_v15 = vadd.f32 %v1077_v13, %v1076_v11 }
 0x440   : > { %v1087_v61 = vadd.f32 %v1086_v59, %v1085_v14 }
 0x442   : > { %v1088_v16 = vsel %vm388_vm1, %v1078_v15, %v1087_v61 }
 0x443   : > { %1796 = vmatmul.mubr.f32.vlgmr.msra.gmra.mrb[8].mxu1 %v1088_v16 }
 0x444   : > { %1800 = vmatprep.mubr.msk.f32.mxu1 %vm1956_vm6, %v1957_v57  ;;  %1799 = vmatpush3.msra.mxu1 %v1191_v17 }
 0x445   : > { %1803 = vmatprep.subr.bf16.mxu1 %v1957_v57 }
 0x516   : > { %v1171_v18 = vpop.f32.mrb[8].mxu1 }
 0x517   : > { %v1175_v19 = vmul.f32 0.00390625, %v1171_v18  ;;  %v1797_v21 = vpop.f32.mrb[9].mxu1 }
 0x519   : > { %v1176_v22 = vmul.f32 %v1175_v19, %v1175_v19 }
 0x51b   : > { %v1178_v23 = vrot.slane %v1176_v22, 7 }
 0x51d   : > { %v1180_v24 = vsub.f32 %v1175_v19, %v1178_v23 }
 0x51f   : > { %v1181_v8 = vadd.f32 1e-05, %v1180_v24 }
 0x521   : > { %1943 = vrsqrt.f32 %v1181_v8 }
 0x52b   : > { %v1944_v25 = vpop.eup %1943 }
 0x52c   : > { %v1184_v26 = vrot.slane %v1944_v25, 1 }
 0x52e   : > { %v1186_v27 = vmul.f32 %v1184_v26, %v1175_v19 }
 0x530   : > { %v1188_v28 = vrot.slane %v1186_v27, 7 }
 0x532   : > { %v1190_v29 = vsel %vm388_vm1, %v1184_v26, %v1188_v28 }
 0x533   : > { %1801 = vmatmul.mubr.msk.f32.vlgmr.msra.gmra.mrb[10].mxu1 %vm679_vm7, %v1190_v29 }
 0x534   : > { %1805 = vmatprep.mubr.msk.bf16.mxu1 %vm1956_vm6, %v1957_v57 }
 0x606   : > { %v1261_v30 = vpop.f32.mrb[10].mxu1 }
 0x607   : > { %v1268_v31 = vrot.slane %v1261_v30, %v755_v58  ;;  %v1802_v32 = vpop.f32.mrb[11].mxu1  ;;  %v1274_v35 = vrot.slane %v1261_v30, %v761_v60  ;;  %v1933_v60 = vld [vmem:[%s2399_s8] sm:$0xff]  }
 0x608   : > { %1810 = vmatpush3.bf16.msra.mxu0 %v1933_v60 }
 0x609   : > { %v1269_v33 = vmul.f32 %v1268_v31, %v1066_v63  ;;  %v1270_v34 = vmul.f32 %v1268_v31, %v1069_v1  ;;  %1811 = vmatprep.subr.bf16.mxu0 %v1957_v57  ;;  %v1940_v1 = vld [vmem:[%s2399_s8 + $0x38] sm:$0xff]  }
 0x60b   : > { %v1275_v36 = vsub.f32 %v1269_v33, %v1274_v35  ;;  %v1276_v37 = vsub.f32 %v1270_v34, %v1274_v35 }
 0x60c   : > { %1812 = vmatpush3.bf16.msra.mxu0 %v1934_v46 }
 0x60d   : > { %v1277_v38 = vmax.f32 %v1275_v36, 0.0  ;;  %v1278_v39 = vmax.f32 %v1276_v37, 0.0  ;;  %1813 = vmatprep.subr.bf16.mxu0 %v1957_v57 }
 0x60f   : > { %v1621_v40 = vpack.c.bf16 %v1278_v39, %v1277_v38  ;;  %v1292_v41 = vrot.slane %v1277_v38, 1  ;;  %v1293_v42 = vrot.slane %v1278_v39, 1 }
 0x610   : > { %1814 = vmatpush3.bf16.msra.mxu0 %v1935_v47 }
 0x611   : > { %1622 = vst [vmem:[%s366_s26] sm:$0xff] %v1621_v40   ;;  %v1294_v58 = vsel %vm410_vm4, %v1292_v41, %v1293_v42  ;;  %v1298_v43 = vsel %vm410_vm4, %v1293_v42, %v1292_v41  ;;  %1815 = vmatprep.subr.bf16.mxu0 %v1957_v57 }
 0x612   : > { %v1299_v44 = vmax.f32 %v1277_v38, %v1294_v58  ;;  %v1300_v56 = vmax.f32 %v1278_v39, %v1298_v43 }
 0x614   : > { %v1891_v45 = vpack.i.bf16 %v1300_v56, %v1299_v44  ;;  %1816 = vmatpush3.bf16.msra.mxu0 %v1936_v48 }
 0x615   : > { %1817 = vmatprep.subr.bf16.mxu0 %v1957_v57 }
 0x616   : > { %1892 = vrot.lane.b32.xlu0 %v1891_v45, %s1958_s17  ;;  %s370_s17 = scalar_lea.vmem %s2401_s10, %s1560_s28 }
 0x618   : > { %1818 = vmatpush3.bf16.msra.mxu0 %v1937_v49 }
 0x619   : > { %1819 = vmatprep.subr.bf16.mxu0 %v1957_v57 }
 0x61c   : > { %1820 = vmatpush3.bf16.msra.mxu0 %v1938_v50 }
 0x61d   : > { %1821 = vmatprep.subr.bf16.mxu0 %v1957_v57 }
 0x620   : > { %1822 = vmatpush3.bf16.msra.mxu0 %v1939_v51 }
 0x621   : > { %1823 = vmatprep.subr.bf16.mxu0 %v1957_v57 }
 0x624   : > { %1824 = vmatpush3.bf16.msra.mxu0 %v1940_v1 }
 0x688   : > { %v1893_v52 = vpop.permute.xlu0 %1892 }
 0x689   : > { %v1895_v53 = vunpack.i.h.bf16 %v1893_v52  ;;  %v1894_v54 = vunpack.i.l.bf16 %v1893_v52 }
 0x68b   : > { %v1310_v55 = vmax.f32 %v1300_v56, %v1895_v53  ;;  %v1309_v62 = vmax.f32 %v1299_v44, %v1894_v54 }
 0x68d   : > { %v1311_v63 = vpack.c.bf16 %v1310_v55, %v1309_v62 }
 0x68f   : > { %1804 = vmatpush3.bf16.msra.mxu1 %v1311_v63 }
 0x692   : > { %1806 = vmatmul.mubr.msk.bf16.vlgmr.msra.gmra.mrb[12].mxu1 %vm1313_vm8, %v1312_v0 }
 0x765   : > { %v1351_v57 = vpop.f32.mrb[12].mxu1 }
 0x766   : > { %v1357_v2 = vpack.c.bf16 %v1351_v57, %v1351_v57  ;;  %v1807_v3 = vpop.f32.mrb[13].mxu1 }
 0x767   : > { %v1354_v4 = vpop.f32.mrb[14].mxu1 }
 0x768   : > { %v1808_v5 = vpop.f32.mrb[15].mxu1  ;;  %1826 = vmatmul.mubr.bf16.vlgmr.msra.gmra.mrb[8].mxu0 %v1357_v2 }
 0x83b   : > { %v1456_v20 = vpop.f32.mrb[8].mxu0 }
 0x83c   : > { %v1462_v6 = vpack.c.bf16 %v1456_v20, %v1456_v20  ;;  %v1827_v7 = vpop.f32.mrb[9].mxu0 }
 0x83d   : > { %v1459_v9 = vpop.f32.mrb[10].mxu0 }
 0x83e   : > { %1464 = vst.msk [vmem:[%s370_s17] sm:$0xf] %vm1463_vm9, %v1462_v6  ;;  %v1828_v10 = vpop.f32.mrb[11].mxu0 }
 0x83f PF: > { %s21_s13 = sadd.s32 1, %s1951_s13  }
 0x840   : > { %p18_p4 = scmp.ge.s32.totalorder %s21_s13, 4  }
 0x842   :  { %20 = sbr.rel (!%p18_p4) target bundleno = 1 (0x1), region = 98 }

// kernel: ublock_forward.4
= control target key start
LH: loop header
LB: loop body
LE: loop exit
PB: predicated region body
PF: predicated region fallthrough
CT: control target
= control target key end

     0   :  { %s1424_s24 = smov 0   ;;  %s1769_s0 = inlined_call_operand.vmem [shape: bf16[2,8,64], index: 0, kind: input, shape index: {}]   ;;  %s1770_s1 = inlined_call_operand.vmem [shape: bf16[192,128], index: 1, kind: input, shape index: {}]   ;;  %s1771_s2 = inlined_call_operand.vmem [shape: bf16[128,256], index: 2, kind: input, shape index: {}]   ;;  %s1772_s3 = inlined_call_operand.vmem [shape: f32[128,16], index: 3, kind: input, shape index: {}]   ;;  %s1773_s4 = inlined_call_operand.vmem [shape: f32[256,32], index: 4, kind: input, shape index: {}]   ;;  %s1774_s5 = inlined_call_operand.vmem [shape: f32[16,128], index: 5, kind: input, shape index: {}]   ;;  %s1775_s6 = inlined_call_operand.vmem [shape: f32[32,256], index: 6, kind: input, shape index: {}]   ;;  %s1776_s7 = inlined_call_operand.vmem [shape: bf16[2,8,256], index: 7, kind: output, shape index: {}]  }
   0x1 LB: > { %s1108_s25 = sadd.s32 4294967295, %s1377_s24   ;;  %p1112_p0 = scmp.ge.s32.totalorder %s1377_s24, 1  ;;  %s1377_s24 = sphi %s1424_s24, %s17_s24  }
   0x2   : > { %p236_p1 = scmp.lt.s32.totalorder %s1377_s24, 3 }
   0x4   : > { %p237_p2 = pnand %p1112_p0, %p236_p1 }
   0x5   : > { %p267_p3 = scmp.lt.s32.totalorder (!%p237_p2), %s1108_s25, 1  ;;  %v1331_v0 = vld [vmem:[%s1770_s1] sm:$0xff] (!%p237_p2)   ;;  %v1379_v1 = vmov (!%p237_p2), 0   ;;  %v1332_v2 = vld [vmem:[%s1770_s1 + $0x8] sm:$0xff] (!%p237_p2)   ;;  %vm289_vm0 = vcmask (!%p237_p2), 1040384   ;;  %vm293_vm2 = vcmask (!%p237_p2), 1044480  }
   0x6   : > { %240 = sbr.rel (%p237_p2) target bundleno = 1532 (0x5fc), region = 48  ;;  %411 = vmatprep.subr.bf16.mxu0 (!%p237_p2), %v1379_v1  ;;  %vm290_vm1 = vsmask.f32 (!%p237_p2), 256  ;;  %v1333_v4 = vld [vmem:[%s1770_s1 + $0x10] sm:$0xff] (!%p237_p2)   ;;  %vm294_vm3 = vsmask.f32 (!%p237_p2), 4352 }
   0x7   : > { %412 = vmatpush1.bf16.msra.mxu0 (!%p237_p2), %v1331_v0  ;;  %vm291_vm4 = vmand (!%p237_p2), %vm289_vm0, %vm290_vm1  ;;  %v1334_v8 = vld [vmem:[%s1770_s1 + $0x18] sm:$0xff] (!%p237_p2)   ;;  %v1380_v10 = vmov (!%p237_p2), 0.0|0.0   ;;  %v466_v12 = vld [vmem:[%s1772_s3] sm:$0xff] (!%p237_p2)  ;;  %vm308_vm6 = vcmask (!%p237_p2), 523264   ;;  %vm1382_vm7 = vmmov (!%p237_p2), 0   ;;  %v1383_v51 = vmov (!%p237_p2), 0.0  }
   0x8   : > { %413 = vmatprep.subr.bf16.mxu0 (!%p237_p2), %v1379_v1  ;;  %vm295_vm5 = vmand (!%p237_p2), %vm293_vm2, %vm294_vm3  ;;  %1250 = vmatprep.subr.bf16.mxu1 (!%p237_p2), %v1380_v10  ;;  %v467_v13 = vld [vmem:[%s1772_s3 + $0x8] sm:$0xff] (!%p237_p2)  ;;  %v1335_v15 = vld [vmem:[%s1770_s1 + $0x20] sm:$0xff] (!%p237_p2)   ;;  %vm570_vm8 = vcmask (!%p237_p2), 130048   ;;  %vm947_vm9 = vcmask (!%p237_p2), 261120  }
   0x9   : > { %v1251_v16 = vpack.c.bf16 (!%p237_p2), %v467_v13, %v466_v12  ;;  %v468_v17 = vld [vmem:[%s1772_s3 + $0x10] sm:$0xff] (!%p237_p2)  ;;  %v469_v18 = vld [vmem:[%s1772_s3 + $0x18] sm:$0xff] (!%p237_p2)  ;;  %v470_v22 = vld [vmem:[%s1772_s3 + $0x20] sm:$0xff] (!%p237_p2)  ;;  %1240 = vmatprep.mubr.msk.f32.mxu1 (!%p237_p2), %vm1382_vm7, %v1383_v51 }
   0xa   : > { %v471_v23 = vld [vmem:[%s1772_s3 + $0x28] sm:$0xff] (!%p237_p2)  ;;  %v1254_v25 = vpack.c.bf16 (!%p237_p2), %v469_v18, %v468_v17  ;;  %v472_v29 = vld [vmem:[%s1772_s3 + $0x30] sm:$0xff] (!%p237_p2)  ;;  %v473_v30 = vld [vmem:[%s1772_s3 + $0x38] sm:$0xff] (!%p237_p2) }
   0xb   : > { %414 = vmatpush1.bf16.msra.mxu0 (!%p237_p2), %v1332_v2  ;;  %v1336_v24 = vld [vmem:[%s1770_s1 + $0x28] sm:$0xff] (!%p237_p2)   ;;  %1252 = vmatpush3.bf16.msra.mxu1 (!%p237_p2), %v1251_v16  ;;  %v1257_v28 = vpack.c.bf16 (!%p237_p2), %v471_v23, %v470_v22  ;;  %v1337_v31 = vld [vmem:[%s1770_s1 + $0x30] sm:$0xff] (!%p237_p2)   ;;  %v1260_v32 = vpack.c.bf16 (!%p237_p2), %v473_v30, %v472_v29  ;;  %v1338_v33 = vld [vmem:[%s1770_s1 + $0x38] sm:$0xff] (!%p237_p2)  }
   0xc   : > { %415 = vmatprep.subr.bf16.mxu0 (!%p237_p2), %v1379_v1  ;;  %1253 = vmatprep.subr.bf16.mxu1 (!%p237_p2), %v1380_v10  ;;  %v1339_v34 = vld [vmem:[%s1770_s1 + $0x40] sm:$0xff] (!%p237_p2)   ;;  %v1340_v35 = vld [vmem:[%s1770_s1 + $0x48] sm:$0xff] (!%p237_p2)   ;;  %v1341_v36 = vld [vmem:[%s1770_s1 + $0x50] sm:$0xff] (!%p237_p2)  }
   0xd   : > { %s1778_s25 = smov (!%p267_p3, %s1108_s25), 1  ;;  %v1342_v37 = vld [vmem:[%s1770_s1 + $0x58] sm:$0xff]   ;;  %v474_v40 = vld [vmem:[%s1772_s3 + $0x40] sm:$0xff]  ;;  %v475_v41 = vld [vmem:[%s1772_s3 + $0x48] sm:$0xff] }
   0xe   : > { %s1113_s30 = sshll.u32 %s1778_s25, 2  ;;  %v1263_v42 = vpack.c.bf16 %v475_v41, %v474_v40  ;;  %v476_v43 = vld [vmem:[%s1772_s3 + $0x50] sm:$0xff]  ;;  %v477_v44 = vld [vmem:[%s1772_s3 + $0x58] sm:$0xff]  ;;  %v478_v46 = vld [vmem:[%s1772_s3 + $0x60] sm:$0xff]  ;;  %s1151_s12 = sshll.u32 %s1778_s25, 3 }
   0xf   : > { %s270_s10 = scalar_lea.vmem %s1769_s0, %s1113_s30  ;;  %416 = vmatpush1.bf16.msra.mxu0 %v1333_v4  ;;  %1255 = vmatpush3.bf16.msra.mxu1 %v1254_v25  ;;  %v1266_v45 = vpack.c.bf16 %v477_v44, %v476_v43  ;;  %v479_v47 = vld [vmem:[%s1772_s3 + $0x68] sm:$0xff]  ;;  %v480_v49 = vld [vmem:[%s1772_s3 + $0x70] sm:$0xff]  ;;  %v481_v50 = vld [vmem:[%s1772_s3 + $0x78] sm:$0xff]  ;;  %s275_s15 = scalar_lea.vmem %s1776_s7, %s1151_s12 }
  0x10   : > { %v1330_v3 = vld [vmem:[%s270_s10] ss:$0 sps:$4 sm:$0xff]   ;;  %417 = vmatprep.subr.bf16.mxu0 %v1379_v1  ;;  %s1381_s10 = smov 64   ;;  %1256 = vmatprep.subr.bf16.mxu1 %v1380_v10  ;;  %v1269_v48 = vpack.c.bf16 %v479_v47, %v478_v46  ;;  %v1272_v52 = vpack.c.bf16 %v481_v50, %v480_v49  ;;  %v1354_v29 = vld [vmem:[%s1771_s2 + $0x34] ss:$8 sps:$4 sm:$0xff]   ;;  %v842_v50 = vld [vmem:[%s1773_s4 + $0xa8] sm:$0xff] }
  0x11   : > { %v282_v5 = vshrl.u32 %v1330_v3, 16  ;;  %v285_v6 = vshll.u32 %v1330_v3, 16  ;;  %v1343_v23 = vld [vmem:[%s1771_s2] ss:$8 sps:$4 sm:$0xff]   ;;  %v1357_v30 = vld [vmem:[%s1771_s2 + $0x44] ss:$8 sps:$4 sm:$0xff]  }
  0x12   : > { %v821_v40 = vld [vmem:[%s1773_s4] sm:$0xff]  ;;  %v839_v43 = vld [vmem:[%s1773_s4 + $0x90] sm:$0xff]  ;;  %v840_v44 = vld [vmem:[%s1773_s4 + $0x98] sm:$0xff] }
  0x13   : > { %v284_v7 = vrot.slane %v282_v5, 7  ;;  %418 = vmatpush1.bf16.msra.mxu0 %v1334_v8  ;;  %1258 = vmatpush3.bf16.msra.mxu1 %v1257_v28  ;;  %v568_v8 = vld [vmem:[%s1774_s5] sm:$0xff]  ;;  %v1281_v46 = vpack.c.bf16 %v840_v44, %v839_v43  ;;  %v823_v47 = vld [vmem:[%s1773_s4 + $0x10] sm:$0xff] }
  0x14   : > { %419 = vmatprep.subr.bf16.mxu0 %v1379_v1  ;;  %1259 = vmatprep.subr.bf16.mxu1 %v1380_v10  ;;  %v1349_v28 = vld [vmem:[%s1771_s2 + $0x20] ss:$8 sps:$4 sm:$0xff]  }
  0x15   : > { %v287_v9 = vor.u32 %v285_v6, %v284_v7  ;;  %v841_v49 = vld [vmem:[%s1773_s4 + $0xa0] sm:$0xff] }
  0x17   : > { %v292_v11 = vsel %vm291_vm4, 0, %v287_v9  ;;  %420 = vmatpush1.bf16.msra.mxu0 %v1335_v15  ;;  %1261 = vmatpush3.bf16.msra.mxu1 %v1260_v32  ;;  %v569_v9 = vld [vmem:[%s1774_s5 + $0x8] sm:$0xff]  ;;  %v1360_v32 = vld [vmem:[%s1771_s2 + $0x54] ss:$8 sps:$4 sm:$0xff]  }
  0x18   : > { %v296_v14 = vsel %vm295_vm5, %v292_v11, 0  ;;  %421 = vmatprep.subr.bf16.mxu0 %v1379_v1  ;;  %1262 = vmatprep.subr.bf16.mxu1 %v1380_v10  ;;  %v1345_v11 = vld [vmem:[%s1771_s2 + $0x4] ss:$8 sps:$4 sm:$0xff]  }
  0x19   : > { %v298_v19 = vshrl.u32 %v296_v14, 16  ;;  %v300_v20 = vshll.u32 %v296_v14, 16  ;;  %v307_v21 = vrot.slane %v296_v14, 1 }
  0x1b   : > { %v302_v26 = vrot.slane %v300_v20, 1  ;;  %1129 = vmatprep.mubr.msk.bf16.mxu0 %vm308_vm6, %v307_v21  ;;  %422 = vmatpush1.bf16.msra.mxu0 %v1336_v24  ;;  %v1348_v24 = vld [vmem:[%s1771_s2 + $0x14] ss:$8 sps:$4 sm:$0xff]  }
  0x1c   : > { %423 = vmatprep.subr.bf16.mxu0 %v1379_v1  ;;  %1264 = vmatpush3.bf16.msra.mxu1 %v1263_v42  ;;  %v822_v42 = vld [vmem:[%s1773_s4 + $0x8] sm:$0xff] }
  0x1d   : > { %v303_v27 = vor.u32 %v302_v26, %v298_v19  ;;  %1265 = vmatprep.subr.bf16.mxu1 %v1380_v10  ;;  %v1346_v26 = vld [vmem:[%s1771_s2 + $0x10] ss:$8 sps:$4 sm:$0xff]  }
  0x1f   : > { %304 = vrot.lane.b32.xlu0 %v303_v27, %s1381_s10  ;;  %424 = vmatpush1.bf16.msra.mxu0 %v1337_v31  ;;  %v1351_v27 = vld [vmem:[%s1771_s2 + $0x24] ss:$8 sps:$4 sm:$0xff]   ;;  %v1355_v31 = vld [vmem:[%s1771_s2 + $0x40] ss:$8 sps:$4 sm:$0xff]  }
  0x20   : > { %425 = vmatprep.subr.bf16.mxu0 %v1379_v1  ;;  %1267 = vmatpush3.bf16.msra.mxu1 %v1266_v45  ;;  %v1279_v45 = vpack.c.bf16 %v822_v42, %v821_v40 }
  0x21   : > { %1268 = vmatprep.subr.bf16.mxu1 %v1380_v10 }
  0x23   : > { %426 = vmatpush1.bf16.msra.mxu0 %v1338_v33  ;;  %v1358_v33 = vld [vmem:[%s1771_s2 + $0x50] ss:$8 sps:$4 sm:$0xff]  }
  0x24   : > { %427 = vmatprep.subr.bf16.mxu0 %v1379_v1  ;;  %1270 = vmatpush3.bf16.msra.mxu1 %v1269_v48  ;;  %v824_v48 = vld [vmem:[%s1773_s4 + $0x18] sm:$0xff] }
  0x25   : > { %1271 = vmatprep.subr.bf16.mxu1 %v1380_v10 }
  0x27   : > { %428 = vmatpush1.bf16.msra.mxu0 %v1339_v34  ;;  %v1363_v34 = vld [vmem:[%s1771_s2 + $0x64] ss:$8 sps:$4 sm:$0xff]  }
  0x28   : > { %429 = vmatprep.subr.bf16.mxu0 %v1379_v1  ;;  %1273 = vmatpush3.bf16.msra.mxu1 %v1272_v52  ;;  %v1283_v52 = vpack.c.bf16 %v824_v48, %v823_v47 }
  0x29   : > { %1274 = vmatprep.subr.bf16.mxu1 %v1380_v10  ;;  %v1275_v10 = vpack.c.bf16 %v569_v9, %v568_v8 }
  0x2b   : > { %430 = vmatpush1.bf16.msra.mxu0 %v1340_v35  ;;  %v1361_v35 = vld [vmem:[%s1771_s2 + $0x60] ss:$8 sps:$4 sm:$0xff]  }
  0x2c   : > { %431 = vmatprep.subr.bf16.mxu0 %v1379_v1 }
  0x2f   : > { %432 = vmatpush1.bf16.msra.mxu0 %v1341_v36  ;;  %v1366_v36 = vld [vmem:[%s1771_s2 + $0x74] ss:$8 sps:$4 sm:$0xff]  }
  0x30   : > { %433 = vmatprep.subr.bf16.mxu0 %v1379_v1 }
  0x33   : > { %434 = vmatpush1.bf16.msra.mxu0 %v1342_v37  ;;  %v1364_v37 = vld [vmem:[%s1771_s2 + $0x70] ss:$8 sps:$4 sm:$0xff]  }
  0x91   : > { %v305_v38 = vpop.permute.xlu0 %304 }
  0x92   : > { %v310_v39 = vsel %vm308_vm6, %v296_v14, %v305_v38  ;;  %v837_v38 = vld [vmem:[%s1773_s4 + $0x80] sm:$0xff] }
  0x93   : > { %444 = vmatmul.mubr.bf16.vlgmr.msra.gmra.mrb[0].mxu0 %v310_v39  ;;  %v838_v39 = vld [vmem:[%s1773_s4 + $0x88] sm:$0xff] }
  0x94   : > { %v1277_v41 = vpack.c.bf16 %v838_v39, %v837_v38 }
  0x96   : > { %1278 = vmatprep.subr.bf16.mxu0 %v1277_v41 }
  0x97   : > { %1280 = vmatpush3.bf16.msra.mxu0 %v1279_v45 }
  0x98   : > { %1282 = vmatprep.subr.bf16.mxu0 %v1281_v46 }
  0x9b   : > { %1284 = vmatpush3.bf16.msra.mxu0 %v1283_v52 }
 0x166   : > { %v1548_v53 = vpop.f32.mrb[0].mxu0 }
 0x167   : > { %v451_v54 = vrot.slane %v1548_v53, 4  ;;  %v457_v55 = vmul.f32 %v1548_v53, %v1548_v53  ;;  %v447_v56 = vpop.f32.mrb[1].mxu0 }
 0x168   : > { %v448_v57 = vpop.f32.mrb[2].mxu0  ;;  %v826_v56 = vld [vmem:[%s1773_s4 + $0x28] sm:$0xff] }
 0x169   : > { %v452_v58 = vadd.f32 %v451_v54, %v1548_v53  ;;  %v458_v59 = vrot.slane %v457_v55, 4  ;;  %v449_v60 = vpop.f32.mrb[3].mxu0  ;;  %v1285_v54 = vpack.c.bf16 %v842_v50, %v841_v49  ;;  %v843_v57 = vld [vmem:[%s1773_s4 + $0xb0] sm:$0xff] }
 0x16b   : > { %v453_v61 = vrot.slane %v452_v58, 2  ;;  %v459_v62 = vadd.f32 %v458_v59, %v457_v55  ;;  %v825_v55 = vld [vmem:[%s1773_s4 + $0x20] sm:$0xff]  ;;  %1286 = vmatprep.subr.bf16.mxu0 %v1285_v54 }
 0x16c   : > { %v1287_v59 = vpack.c.bf16 %v826_v56, %v825_v55 }
 0x16d   : > { %v454_v63 = vadd.f32 %v453_v61, %v452_v58  ;;  %v460_v0 = vrot.slane %v459_v62, 2  ;;  %v844_v58 = vld [vmem:[%s1773_s4 + $0xb8] sm:$0xff]  ;;  %v827_v61 = vld [vmem:[%s1773_s4 + $0x30] sm:$0xff] }
 0x16e   : > { %v1289_v60 = vpack.c.bf16 %v844_v58, %v843_v57  ;;  %1288 = vmatpush3.bf16.msra.mxu0 %v1287_v59 }
 0x16f   : > { %v455_v2 = vrot.slane %v454_v63, 1  ;;  %v461_v3 = vadd.f32 %v460_v0, %v459_v62  ;;  %v828_v62 = vld [vmem:[%s1773_s4 + $0x38] sm:$0xff]  ;;  %v644_v0 = vlaneseq }
 0x170   : > { %1290 = vmatprep.subr.bf16.mxu0 %v1289_v60 }
 0x171   : > { %v462_v4 = vrot.slane %v461_v3, 1  ;;  %v456_v5 = vadd.f32 %v455_v2, %v454_v63  ;;  %v1291_v63 = vpack.c.bf16 %v828_v62, %v827_v61  ;;  %v645_v2 = vshrl.u32 %v644_v0, 7 }
 0x173   : > { %v463_v6 = vadd.f32 %v462_v4, %v461_v3  ;;  %1292 = vmatpush3.bf16.msra.mxu0 %v1291_v63  ;;  %v1661_v3 = vsub.s32 0, %v645_v2  ;;  %v1663_v4 = vsub.s32 1, %v645_v2 }
 0x175   : > { %v465_v7 = vsel %vm289_vm0, %v456_v5, %v463_v6 }
 0x176   : > { %1241 = vmatmul.mubr.f32.vlgmr.msra.gmra.mrb[0].mxu1 %v465_v7 }
 0x177   : > { %1247 = vmatprep.mubr.msk.f32.mxu1 %vm1382_vm7, %v1383_v51  ;;  %1276 = vmatpush3.bf16.msra.mxu1 %v1275_v10 }
 0x178   : > { %752 = vmatprep.subr.bf16.mxu1 %v1345_v11 }
 0x249   : > { %v548_v12 = vpop.f32.mrb[0].mxu1 }
 0x24a   : > { %v552_v13 = vmul.f32 0.015625, %v548_v12  ;;  %v1242_v14 = vpop.f32.mrb[1].mxu1 }
 0x24b   : > { %v846_v14 = vld [vmem:[%s1773_s4 + $0xc8] sm:$0xff] }
 0x24c   : > { %v553_v15 = vmul.f32 %v552_v13, %v552_v13 }
 0x24e   : > { %v555_v16 = vrot.slane %v553_v15, 7 }
 0x250   : > { %v557_v17 = vsub.f32 %v552_v13, %v555_v16  ;;  %v830_v16 = vld [vmem:[%s1773_s4 + $0x48] sm:$0xff] }
 0x252   : > { %v558_v18 = vadd.f32 1e-05, %v557_v17 }
 0x254   : > { %1367 = vrsqrt.f32 %v558_v18  ;;  %v848_v18 = vld [vmem:[%s1773_s4 + $0xd8] sm:$0xff] }
 0x25e   : > { %v1368_v19 = vpop.eup %1367 }
 0x25f   : > { %v561_v20 = vrot.slane %v1368_v19, 1 }
 0x261   : > { %v563_v21 = vmul.f32 %v561_v20, %v552_v13  ;;  %v845_v13 = vld [vmem:[%s1773_s4 + $0xc0] sm:$0xff] }
 0x262   : > { %v1293_v15 = vpack.c.bf16 %v846_v14, %v845_v13  ;;  %v944_v13 = vld [vmem:[%s1775_s6 + $0x28] sm:$0xff]  ;;  %v946_v14 = vld [vmem:[%s1775_s6 + $0x38] sm:$0xff] }
 0x263   : > { %v565_v22 = vrot.slane %v563_v21, 7  ;;  %v832_v21 = vld [vmem:[%s1773_s4 + $0x58] sm:$0xff] }
 0x264   : > { %1294 = vmatprep.subr.bf16.mxu0 %v1293_v15  ;;  %v1313_v15 = vpack.c.bf16 %v946_v14, %v944_v13 }
 0x265   : > { %v567_v25 = vsel %vm289_vm0, %v561_v20, %v565_v22  ;;  %v831_v20 = vld [vmem:[%s1773_s4 + $0x50] sm:$0xff] }
 0x266   : > { %1248 = vmatmul.mubr.msk.f32.vlgmr.msra.gmra.mrb[2].mxu1 %vm570_vm8, %v567_v25  ;;  %v1299_v22 = vpack.c.bf16 %v832_v21, %v831_v20 }
 0x267   : > { %753 = vmatpush1.bf16.msra.mxu1 %v1343_v23  ;;  %784 = vmatprep.mubr.bf16.mxu1 %v1379_v1  ;;  %v1352_v1 = vld [vmem:[%s1771_s2 + $0x30] ss:$8 sps:$4 sm:$0xff]   ;;  %v849_v23 = vld [vmem:[%s1773_s4 + $0xe0] sm:$0xff] }
 0x268   : > { %754 = vmatprep.subr.bf16.mxu1 %v1348_v24  ;;  %v850_v24 = vld [vmem:[%s1773_s4 + $0xe8] sm:$0xff] }
 0x269   : > { %v1301_v25 = vpack.c.bf16 %v850_v24, %v849_v23 }
 0x26b   : > { %755 = vmatpush1.bf16.msra.mxu1 %v1346_v26  ;;  %v833_v26 = vld [vmem:[%s1773_s4 + $0x60] sm:$0xff] }
 0x26c   : > { %756 = vmatprep.subr.bf16.mxu1 %v1351_v27  ;;  %v834_v27 = vld [vmem:[%s1773_s4 + $0x68] sm:$0xff] }
 0x26f   : > { %757 = vmatpush1.bf16.msra.mxu1 %v1349_v28  ;;  %v1303_v28 = vpack.c.bf16 %v834_v27, %v833_v26 }
 0x270   : > { %758 = vmatprep.subr.bf16.mxu1 %v1354_v29  ;;  %v851_v29 = vld [vmem:[%s1773_s4 + $0xf0] sm:$0xff] }
 0x273   : > { %759 = vmatpush1.bf16.msra.mxu1 %v1352_v1  ;;  %v852_v1 = vld [vmem:[%s1773_s4 + $0xf8] sm:$0xff] }
 0x274   : > { %760 = vmatprep.subr.bf16.mxu1 %v1357_v30  ;;  %v835_v30 = vld [vmem:[%s1773_s4 + $0x70] sm:$0xff] }
 0x277   : > { %761 = vmatpush1.bf16.msra.mxu1 %v1355_v31  ;;  %v1305_v31 = vpack.c.bf16 %v852_v1, %v851_v29 }
 0x278   : > { %762 = vmatprep.subr.bf16.mxu1 %v1360_v32  ;;  %v836_v32 = vld [vmem:[%s1773_s4 + $0x78] sm:$0xff] }
 0x27b   : > { %763 = vmatpush1.bf16.msra.mxu1 %v1358_v33  ;;  %v1307_v33 = vpack.c.bf16 %v836_v32, %v835_v30 }
 0x27c   : > { %764 = vmatprep.subr.bf16.mxu1 %v1363_v34 }
 0x27f   : > { %765 = vmatpush1.bf16.msra.mxu1 %v1361_v35 }
 0x280   : > { %766 = vmatprep.subr.bf16.mxu1 %v1366_v36 }
 0x283   : > { %767 = vmatpush1.bf16.msra.mxu1 %v1364_v37 }
 0x339   : > { %v640_v5 = vpop.f32.mrb[2].mxu1 }
 0x33a   : > { %v647_v6 = vrot.slane %v640_v5, %v1661_v3  ;;  %v1249_v7 = vpop.f32.mrb[3].mxu1  ;;  %v652_v9 = vrot.slane %v640_v5, %v1663_v4 }
 0x33b   : > { %v940_v7 = vld [vmem:[%s1775_s6 + $0x8] sm:$0xff] }
 0x33c   : > { %v648_v8 = vmul.f32 %v647_v6, %v1548_v53  ;;  %v829_v53 = vld [vmem:[%s1773_s4 + $0x40] sm:$0xff] }
 0x33d   : > { %v1295_v17 = vpack.c.bf16 %v830_v16, %v829_v53  ;;  %v943_v53 = vld [vmem:[%s1775_s6 + $0x20] sm:$0xff]  ;;  %v945_v16 = vld [vmem:[%s1775_s6 + $0x30] sm:$0xff] }
 0x33e   : > { %v653_v10 = vsub.f32 %v648_v8, %v652_v9  ;;  %v942_v8 = vld [vmem:[%s1775_s6 + $0x18] sm:$0xff] }
 0x33f   : > { %1296 = vmatpush3.bf16.msra.mxu0 %v1295_v17  ;;  %v1309_v9 = vpack.c.bf16 %v942_v8, %v940_v7  ;;  %v1315_v17 = vpack.c.bf16 %v945_v16, %v943_v53 }
 0x340   : > { %v654_v11 = vmax.f32 %v653_v10, 0.0  ;;  %v939_v10 = vld [vmem:[%s1775_s6] sm:$0xff] }
 0x341   : > { %1310 = vmatprep.subr.bf16.mxu1 %v1309_v9 }
 0x342   : > { %v655_v12 = vpack.c.bf16 %v654_v11, %v654_v11  ;;  %v941_v11 = vld [vmem:[%s1775_s6 + $0x10] sm:$0xff] }
 0x344   : > { %785 = vmatmul.mubr.bf16.vlgmr.msra.gmra.mrb[4].mxu1 %v655_v12  ;;  %v1311_v12 = vpack.c.bf16 %v941_v11, %v939_v10 }
 0x345   : > { %1015 = vmatprep.mubr.f32.mxu1 %v1383_v51  ;;  %v847_v51 = vld [vmem:[%s1773_s4 + $0xd0] sm:$0xff] }
 0x346   : > { %v1297_v19 = vpack.c.bf16 %v848_v18, %v847_v51  ;;  %1312 = vmatpush1.bf16.msra.mxu1 %v1311_v12 }
 0x347   : > { %1314 = vmatprep.subr.bf16.mxu1 %v1313_v15 }
 0x348   : > { %1298 = vmatprep.subr.bf16.mxu0 %v1297_v19 }
 0x349   : > { %1300 = vmatpush3.bf16.msra.mxu0 %v1299_v22 }
 0x34a   : > { %1302 = vmatprep.subr.bf16.mxu0 %v1301_v25  ;;  %1316 = vmatpush1.bf16.msra.mxu1 %v1315_v17 }
 0x34d   : > { %1304 = vmatpush3.bf16.msra.mxu0 %v1303_v28 }
 0x34e   : > { %1306 = vmatprep.subr.bf16.mxu0 %v1305_v31 }
 0x351   : > { %1308 = vmatpush3.bf16.msra.mxu0 %v1307_v33 }
 0x417   : > { %v1717_v34 = vpop.f32.mrb[4].mxu1 }
 0x418   : > { %v793_v35 = vrot.slane %v1717_v34, 4  ;;  %v805_v36 = vmul.f32 %v1717_v34, %v1717_v34  ;;  %v1722_v37 = vpop.f32.mrb[5].mxu1 }
 0x419   : > { %v799_v38 = vrot.slane %v1722_v37, 4  ;;  %v806_v39 = vmul.f32 %v1722_v37, %v1722_v37  ;;  %v790_v40 = vpop.f32.mrb[6].mxu1 }
 0x41a   : > { %v794_v41 = vadd.f32 %v793_v35, %v1717_v34  ;;  %v807_v42 = vrot.slane %v805_v36, 4  ;;  %v791_v43 = vpop.f32.mrb[7].mxu1 }
 0x41b   : > { %v800_v44 = vadd.f32 %v799_v38, %v1722_v37  ;;  %v813_v45 = vrot.slane %v806_v39, 4 }
 0x41c   : > { %v795_v46 = vrot.slane %v794_v41, 2  ;;  %v808_v47 = vadd.f32 %v807_v42, %v805_v36 }
 0x41d   : > { %v801_v48 = vrot.slane %v800_v44, 2  ;;  %v814_v49 = vadd.f32 %v813_v45, %v806_v39 }
 0x41e   : > { %v796_v50 = vadd.f32 %v795_v46, %v794_v41  ;;  %v809_v52 = vrot.slane %v808_v47, 2 }
 0x41f   : > { %v802_v54 = vadd.f32 %v801_v48, %v800_v44  ;;  %v815_v55 = vrot.slane %v814_v49, 2 }
 0x420   : > { %v810_v56 = vadd.f32 %v809_v52, %v808_v47  ;;  %v797_v59 = vrot.slane %v796_v50, 1 }
 0x421   : > { %v803_v57 = vrot.slane %v802_v54, 1  ;;  %v816_v58 = vadd.f32 %v815_v55, %v814_v49 }
 0x422   : > { %v811_v60 = vrot.slane %v810_v56, 1  ;;  %v798_v2 = vadd.f32 %v797_v59, %v796_v50 }
 0x423   : > { %v817_v61 = vrot.slane %v816_v58, 1  ;;  %v804_v63 = vadd.f32 %v803_v57, %v802_v54 }
 0x424   : > { %v812_v62 = vadd.f32 %v811_v60, %v810_v56 }
 0x425   : > { %v818_v0 = vadd.f32 %v817_v61, %v816_v58 }
 0x426   : > { %v819_v6 = vsel %vm289_vm0, %v798_v2, %v812_v62 }
 0x427   : > { %v820_v5 = vsel %vm289_vm0, %v804_v63, %v818_v0 }
 0x428   : > { %917 = vmatprep.mubr.f32.mxu0 %v820_v5 }
 0x429   : > { %918 = vmatmul.mubr.f32.vlgmr.msra.gmra.mrb[4].mxu0 %v819_v6 }
 0x4fc   : > { %v1205_v51 = vpop.f32.mrb[4].mxu0 }
 0x4fd   : > { %v1206_v18 = vpop.f32.mrb[5].mxu0 }
 0x4fe   : > { %v1207_v19 = vadd.f32 %v1206_v18, %v1205_v51 }
 0x500   : > { %v923_v20 = vmul.f32 0.015625, %v1207_v19 }
 0x502   : > { %v924_v21 = vmul.f32 %v923_v20, %v923_v20 }
 0x504   : > { %v926_v22 = vrot.slane %v924_v21, 7 }
 0x506   : > { %v928_v23 = vsub.f32 %v923_v20, %v926_v22 }
 0x508   : > { %v929_v24 = vadd.f32 1e-05, %v928_v23 }
 0x50a   : > { %1369 = vrsqrt.f32 %v929_v24 }
 0x514   : > { %v1370_v25 = vpop.eup %1369 }
 0x515   : > { %v932_v26 = vrot.slane %v1370_v25, 1 }
 0x517   : > { %v934_v27 = vmul.f32 %v932_v26, %v923_v20 }
 0x519   : > { %v936_v28 = vrot.slane %v934_v27, 7 }
 0x51b   : > { %v938_v29 = vsel %vm289_vm0, %v932_v26, %v936_v28 }
 0x51c   : > { %1147 = vmatmul.mubr.msk.f32.vlgmr.msra.gmra.mrb[8].mxu1 %vm947_vm9, %v938_v29 }
 0x5ef   : > { %v1017_v1 = vpop.f32.mrb[8].mxu1 }
 0x5f0   : > { %v1025_v30 = vrot.slane %v1017_v1, %v1661_v3  ;;  %v1019_v31 = vpop.f32.mrb[9].mxu1  ;;  %v1035_v35 = vrot.slane %v1017_v1, %v1663_v4 }
 0x5f1   : > { %v1029_v32 = vrot.slane %v1019_v31, %v1661_v3  ;;  %v1039_v38 = vrot.slane %v1019_v31, %v1663_v4 }
 0x5f2   : > { %v1030_v33 = vmul.f32 %v1025_v30, %v1717_v34 }
 0x5f3   : > { %v1031_v36 = vmul.f32 %v1029_v32, %v1722_v37 }
 0x5f4   : > { %v1040_v39 = vsub.f32 %v1030_v33, %v1035_v35 }
 0x5f5   : > { %v1041_v40 = vsub.f32 %v1031_v36, %v1039_v38 }
 0x5f6   : > { %v1042_v41 = vmax.f32 %v1040_v39, 0.0 }
 0x5f7   : > { %v1043_v42 = vmax.f32 %v1041_v40, 0.0 }
 0x5f9   : > { %v1152_v43 = vpack.c.bf16 %v1043_v42, %v1042_v41 }
 0x5fb   : > { %1052 = vst [vmem:[%s275_s15] sm:$0xff] %v1152_v43 }
 0x5fc PF: > { %s17_s24 = sadd.s32 1, %s1377_s24  }
 0x5fd   : > { %p14_p4 = scmp.ge.s32.totalorder %s17_s24, 4  }
 0x5ff   :  { %16 = sbr.rel (!%p14_p4) target bundleno = 1 (0x1), region = 78 }

// kernel: ublock_forward.5
= control target key start
LH: loop header
LB: loop body
LE: loop exit
PB: predicated region body
PF: predicated region fallthrough
CT: control target
= control target key end

     0   :  { %s2340_s30 = smov 0   ;;  %s2799_s0 = inlined_call_operand.vmem [shape: bf16[2,16,128], index: 0, kind: input, shape index: {}]   ;;  %s2800_s1 = inlined_call_operand.vmem [shape: bf16[2,16,128], index: 1, kind: input, shape index: {}]   ;;  %s2801_s2 = inlined_call_operand.vmem [shape: bf16[384,128], index: 2, kind: input, shape index: {}]   ;;  %s2802_s3 = inlined_call_operand.vmem [shape: bf16[384,128], index: 3, kind: input, shape index: {}]   ;;  %s2803_s4 = inlined_call_operand.vmem [shape: bf16[384,128], index: 4, kind: input, shape index: {}]   ;;  %s2804_s5 = inlined_call_operand.vmem [shape: f32[128,8], index: 5, kind: input, shape index: {}, may-alias: {5,6}]   ;;  %s2805_s6 = inlined_call_operand.vmem [shape: f32[128,8], index: 6, kind: input, shape index: {}, may-alias: {5,6}]   ;;  %s2806_s7 = inlined_call_operand.vmem [shape: f32[8,128], index: 7, kind: input, shape index: {}, may-alias: {7,8}]   ;;  %s2807_s8 = inlined_call_operand.vmem [shape: f32[8,128], index: 8, kind: input, shape index: {}, may-alias: {7,8}]   ;;  %s2808_s9 = inlined_call_operand.vmem [shape: f32[2,16,128], index: 9, kind: output, shape index: {}]  }
   0x1 LB: > { %s1771_s10 = sadd.s32 4294967295, %s2285_s30   ;;  %p1775_p0 = scmp.ge.s32.totalorder %s2285_s30, 1  ;;  %s2285_s30 = sphi %s2340_s30, %s19_s30  }
   0x2   : > { %p297_p1 = scmp.lt.s32.totalorder %s2285_s30, 3 }
   0x4   : > { %p298_p2 = pnand %p1775_p0, %p297_p1 }
   0x5   : > { %v2201_v0 = vld [vmem:[%s2802_s3 + $0x40] sm:$0xff] (!%p298_p2)   ;;  %v2287_v1 = vmov (!%p298_p2), 0.0   ;;  %v2204_v4 = vld [vmem:[%s2802_s3 + $0x48] sm:$0xff] (!%p298_p2)   ;;  %vm2288_vm0 = vmmov (!%p298_p2), 0   ;;  %v2207_v7 = vld [vmem:[%s2802_s3 + $0x50] sm:$0xff] (!%p298_p2)   ;;  %p338_p3 = scmp.lt.s32.totalorder (!%p298_p2), %s1771_s10, 1 }
   0x6   : > { %301 = sbr.rel (%p298_p2) target bundleno = 1484 (0x5cc), region = 56  ;;  %1994 = vmatprep.subr.bf16.mxu1 (!%p298_p2), %v2287_v1  ;;  %v2202_v2 = vld [vmem:[%s2802_s3 + $0x80] sm:$0xff] (!%p298_p2)   ;;  %1863 = vmatprep.subr.bf16.mxu0 (!%p298_p2), %v2201_v0  ;;  %v2205_v5 = vld [vmem:[%s2802_s3 + $0x88] sm:$0xff] (!%p298_p2)   ;;  %v2208_v8 = vld [vmem:[%s2802_s3 + $0x90] sm:$0xff] (!%p298_p2)   ;;  %vm372_vm1 = vcmask (!%p298_p2), 1040384   ;;  %vm393_vm4 = vcmask (!%p298_p2), 1046528  }
   0x7   : > { %v2203_v3 = vld [vmem:[%s2802_s3] sm:$0xff] (!%p298_p2)   ;;  %1995 = vmatpush3.bf16.msra.mxu1 (!%p298_p2), %v2202_v2  ;;  %v2206_v6 = vld [vmem:[%s2802_s3 + $0x8] sm:$0xff] (!%p298_p2)   ;;  %2010 = vmatprep.mubr.msk.bf16.mxu1 (!%p298_p2), %vm2288_vm0, %v2287_v1  ;;  %v2209_v9 = vld [vmem:[%s2802_s3 + $0x10] sm:$0xff] (!%p298_p2)   ;;  %vm373_vm2 = vsmask.f32 (!%p298_p2), 256  ;;  %vm1102_vm6 = vcmask (!%p298_p2), 64512  }
   0x8   : > { %1864 = vmatpush3.bf16.msra.mxu0 (!%p298_p2), %v2203_v3  ;;  %1996 = vmatprep.subr.bf16.mxu1 (!%p298_p2), %v2287_v1  ;;  %v2210_v10 = vld [vmem:[%s2802_s3 + $0x58] sm:$0xff] (!%p298_p2)   ;;  %v2213_v13 = vld [vmem:[%s2802_s3 + $0x60] sm:$0xff] (!%p298_p2)   ;;  %v2216_v16 = vld [vmem:[%s2802_s3 + $0x68] sm:$0xff] (!%p298_p2)   ;;  %vm377_vm5 = vsmask.f32 (!%p298_p2), 7424 }
   0x9   : > { %1865 = vmatprep.subr.bf16.mxu0 (!%p298_p2), %v2204_v4  ;;  %v2211_v11 = vld [vmem:[%s2802_s3 + $0x98] sm:$0xff] (!%p298_p2)   ;;  %v2214_v14 = vld [vmem:[%s2802_s3 + $0xa0] sm:$0xff] (!%p298_p2)   ;;  %v2217_v17 = vld [vmem:[%s2802_s3 + $0xa8] sm:$0xff] (!%p298_p2)  }
   0xa   : > { %v2212_v12 = vld [vmem:[%s2802_s3 + $0x18] sm:$0xff] (!%p298_p2)   ;;  %v2215_v15 = vld [vmem:[%s2802_s3 + $0x20] sm:$0xff] (!%p298_p2)   ;;  %v2218_v18 = vld [vmem:[%s2802_s3 + $0x28] sm:$0xff] (!%p298_p2)  }
   0xb   : > { %1997 = vmatpush3.bf16.msra.mxu1 (!%p298_p2), %v2205_v5  ;;  %v2219_v19 = vld [vmem:[%s2802_s3 + $0x70] sm:$0xff] (!%p298_p2)   ;;  %v2222_v22 = vld [vmem:[%s2802_s3 + $0x78] sm:$0xff] (!%p298_p2)   ;;  %v2226_v29 = vld [vmem:[%s2801_s2 + $0x40] sm:$0xff] (!%p298_p2)  }
   0xc   : > { %1866 = vmatpush3.bf16.msra.mxu0 (!%p298_p2), %v2206_v6  ;;  %1998 = vmatprep.subr.bf16.mxu1 (!%p298_p2), %v2287_v1  ;;  %v2220_v20 = vld [vmem:[%s2802_s3 + $0xb0] sm:$0xff] (!%p298_p2)   ;;  %v2223_v23 = vld [vmem:[%s2802_s3 + $0xb8] sm:$0xff] (!%p298_p2)   ;;  %vm2446_vm3 = vmand (!%p298_p2), %vm372_vm1, %vm373_vm2 }
   0xd   : > { %1867 = vmatprep.subr.bf16.mxu0 %v2207_v7  ;;  %s2812_s10 = smov (!%p338_p3, %s1771_s10), 1  ;;  %v2221_v21 = vld [vmem:[%s2802_s3 + $0x30] sm:$0xff]   ;;  %v2224_v25 = vld [vmem:[%s2802_s3 + $0x38] sm:$0xff]   ;;  %v2227_v39 = vld [vmem:[%s2801_s2 + $0x80] sm:$0xff]  }
   0xe   : > { %s1860_s26 = sshll.u32 %s2812_s10, 3  ;;  %v2230_v44 = vld [vmem:[%s2801_s2 + $0x88] sm:$0xff]   ;;  %v2228_v45 = vld [vmem:[%s2801_s2] sm:$0xff]   ;;  %v2233_v48 = vld [vmem:[%s2801_s2 + $0x90] sm:$0xff]   ;;  %s1862_s22 = sshll.u32 %s2812_s10, 4 }
   0xf   : > { %1999 = vmatpush3.bf16.msra.mxu1 %v2208_v8  ;;  %s347_s16 = scalar_lea.vmem %s2800_s1, %s1860_s26  ;;  %v2229_v47 = vld [vmem:[%s2801_s2 + $0x48] sm:$0xff]   ;;  %v2232_v50 = vld [vmem:[%s2801_s2 + $0x50] sm:$0xff]   ;;  %v2236_v51 = vld [vmem:[%s2801_s2 + $0x98] sm:$0xff]   ;;  %s342_s13 = scalar_lea.vmem %s2799_s0, %s1860_s26 }
  0x10   : > { %1868 = vmatpush3.bf16.msra.mxu0 %v2209_v9  ;;  %2000 = vmatprep.subr.bf16.mxu1 %v2287_v1  ;;  %v2225_v24 = vld [vmem:[%s347_s16] sm:$0xff]   ;;  %v2231_v49 = vld [vmem:[%s2801_s2 + $0x8] sm:$0xff]   ;;  %v2234_v52 = vld [vmem:[%s2801_s2 + $0x10] sm:$0xff]   ;;  %s352_s25 = scalar_lea.vmem %s2808_s9, %s1862_s22 }
  0x11   : > { %1869 = vmatprep.subr.bf16.mxu0 %v2210_v10  ;;  %v452_v26 = vshrl.u32 %v2225_v24, 16  ;;  %v455_v27 = vshll.u32 %v2225_v24, 16  ;;  %v2235_v53 = vld [vmem:[%s2801_s2 + $0x58] sm:$0xff]   ;;  %v2238_v55 = vld [vmem:[%s2801_s2 + $0x60] sm:$0xff]   ;;  %v2242_v58 = vld [vmem:[%s2801_s2 + $0xa8] sm:$0xff]  }
  0x12   : > { %v2237_v54 = vld [vmem:[%s2801_s2 + $0x18] sm:$0xff]   ;;  %v2239_v56 = vld [vmem:[%s2801_s2 + $0xa0] sm:$0xff]   ;;  %v2241_v62 = vld [vmem:[%s2801_s2 + $0x68] sm:$0xff]  }
  0x13   : > { %2001 = vmatpush3.bf16.msra.mxu1 %v2211_v11  ;;  %v454_v28 = vrot.slane %v452_v26, 7  ;;  %v2250_v57 = vld [vmem:[%s342_s13] sm:$0xff]   ;;  %v2243_v0 = vld [vmem:[%s2801_s2 + $0x28] sm:$0xff]   ;;  %v2245_v4 = vld [vmem:[%s2801_s2 + $0xb0] sm:$0xff]  }
  0x14   : > { %1870 = vmatpush3.bf16.msra.mxu0 %v2212_v12  ;;  %2002 = vmatprep.subr.bf16.mxu1 %v2287_v1  ;;  %v2240_v59 = vld [vmem:[%s2801_s2 + $0x20] sm:$0xff]   ;;  %v364_v60 = vshrl.u32 %v2250_v57, 16  ;;  %v367_v61 = vshll.u32 %v2250_v57, 16  ;;  %v2244_v6 = vld [vmem:[%s2801_s2 + $0x70] sm:$0xff]   ;;  %v2248_v8 = vld [vmem:[%s2801_s2 + $0xb8] sm:$0xff]  }
  0x15   : > { %1871 = vmatprep.subr.bf16.mxu0 %v2213_v13  ;;  %v457_v31 = vor.u32 %v455_v27, %v454_v28  ;;  %v461_v32 = vsel %vm2446_vm3, %v454_v28, 0  ;;  %v2246_v13 = vld [vmem:[%s2801_s2 + $0x30] sm:$0xff]   ;;  %v1002_v26 = vld [vmem:[%s2804_s5 + $0x18] sm:$0xff]  ;;  %v1003_v28 = vld [vmem:[%s2804_s5 + $0x20] sm:$0xff] }
  0x16   : > { %v470_v33 = vshll.u32 %v461_v32, 16  ;;  %v478_v34 = vrot.slane %v461_v32, 1  ;;  %v366_v63 = vrot.slane %v364_v60, 7  ;;  %v1005_v32 = vld [vmem:[%s2804_s5 + $0x30] sm:$0xff] }
  0x17   : > { %2003 = vmatpush3.bf16.msra.mxu1 %v2214_v14  ;;  %v460_v35 = vsel %vm2446_vm3, 0, %v457_v31  ;;  %v2247_v14 = vld [vmem:[%s2801_s2 + $0x78] sm:$0xff]  }
  0x18   : > { %1872 = vmatpush3.bf16.msra.mxu0 %v2215_v15  ;;  %2004 = vmatprep.subr.bf16.mxu1 %v2287_v1  ;;  %v463_v36 = vshrl.u32 %v460_v35, 16  ;;  %v465_v37 = vshll.u32 %v460_v35, 16  ;;  %v477_v38 = vrot.slane %v460_v35, 1  ;;  %v472_v41 = vrot.slane %v470_v33, 1  ;;  %v1006_v33 = vld [vmem:[%s2804_s5 + $0x38] sm:$0xff] }
  0x19   : > { %1873 = vmatprep.subr.bf16.mxu0 %v2216_v16  ;;  %v369_v2 = vor.u32 %v367_v61, %v366_v63  ;;  %v376_v3 = vsel %vm2446_vm3, %v366_v63, 0 }
  0x1a   : > { %v467_v40 = vrot.slane %v465_v37, 1  ;;  %v479_v42 = vsel %vm393_vm4, %v477_v38, %v478_v34  ;;  %v386_v5 = vshll.u32 %v376_v3, 16  ;;  %v395_v12 = vrot.slane %v376_v3, 1  ;;  %v1009_v38 = vld [vmem:[%s2804_s5 + $0x50] sm:$0xff] }
  0x1b   : > { %2005 = vmatpush3.bf16.msra.mxu1 %v2217_v17  ;;  %v375_v7 = vsel %vm2446_vm3, 0, %v369_v2  ;;  %v2144_v34 = vpack.c.bf16 %v1006_v33, %v1005_v32 }
  0x1c   : > { %1874 = vmatpush3.bf16.msra.mxu0 %v2218_v18  ;;  %2006 = vmatprep.subr.bf16.mxu1 %v2287_v1  ;;  %v468_v43 = vor.u32 %v467_v40, %v463_v36  ;;  %v379_v9 = vshrl.u32 %v375_v7, 16  ;;  %v381_v10 = vshll.u32 %v375_v7, 16  ;;  %v388_v11 = vrot.slane %v386_v5, 1  ;;  %v2249_v18 = vld [vmem:[%s2801_s2 + $0x38] sm:$0xff]   ;;  %v1008_v36 = vld [vmem:[%s2804_s5 + $0x48] sm:$0xff] }
  0x1d   : > { %1875 = vmatprep.subr.bf16.mxu0 %v2219_v19  ;;  %v394_v16 = vrot.slane %v375_v7, 1 }
  0x1e   : > { %v473_v46 = vsel %vm377_vm5, %v468_v43, %v472_v41  ;;  %v383_v15 = vrot.slane %v381_v10, 1  ;;  %v1011_v41 = vld [vmem:[%s2804_s5 + $0x60] sm:$0xff] }
  0x1f   : > { %2007 = vmatpush3.bf16.msra.mxu1 %v2220_v20  ;;  %705 = vmatprep.mubr.bf16.mxu0 %v473_v46  ;;  %v396_v20 = vsel %vm393_vm4, %v394_v16, %v395_v12 }
  0x20   : > { %1876 = vmatpush3.bf16.msra.mxu0 %v2221_v21  ;;  %2008 = vmatprep.subr.bf16.mxu1 %v2287_v1  ;;  %v384_v17 = vor.u32 %v383_v15, %v379_v9  ;;  %v999_v21 = vld [vmem:[%s2804_s5] sm:$0xff] }
  0x21   : > { %1877 = vmatprep.subr.bf16.mxu0 %v2222_v22  ;;  %v1000_v22 = vld [vmem:[%s2804_s5 + $0x8] sm:$0xff] }
  0x22   : > { %v389_v19 = vsel %vm377_vm5, %v384_v17, %v388_v11  ;;  %v2135_v24 = vpack.c.bf16 %v1000_v22, %v999_v21  ;;  %v1101_v21 = vld [vmem:[%s2806_s7] sm:$0xff] }
  0x23   : > { %2009 = vmatpush3.bf16.msra.mxu1 %v2223_v23  ;;  %v2289_v23 = vmov 0.0|0.0   ;;  %v2251_v22 = vld [vmem:[%s2803_s4 + $0x80] sm:$0xff]  }
  0x24   : > { %1878 = vmatpush3.bf16.msra.mxu0 %v2224_v25  ;;  %2014 = vmatprep.subr.bf16.mxu1 %v2287_v1  ;;  %v1001_v25 = vld [vmem:[%s2804_s5 + $0x10] sm:$0xff] }
  0x25   : > { %1894 = vmatprep.subr.bf16.mxu0 %v2226_v29  ;;  %v2138_v27 = vpack.c.bf16 %v1002_v26, %v1001_v25  ;;  %v1004_v29 = vld [vmem:[%s2804_s5 + $0x28] sm:$0xff]  ;;  %v2256_v26 = vld [vmem:[%s2803_s4 + $0x90] sm:$0xff]  }
  0x26   : > { %2011 = vmatmul.mubr.bf16.vlgmr.msra.gmra.mrb[0].mxu1 %v479_v42  ;;  %v2141_v31 = vpack.c.bf16 %v1004_v29, %v1003_v28  ;;  %v1012_v42 = vld [vmem:[%s2804_s5 + $0x68] sm:$0xff] }
  0x27   : > { %2015 = vmatpush3.bf16.msra.mxu1 %v2227_v39  ;;  %2030 = vmatprep.mubr.msk.bf16.mxu1 %vm2288_vm0, %v2287_v1  ;;  %v1010_v39 = vld [vmem:[%s2804_s5 + $0x58] sm:$0xff]  ;;  %v2153_v43 = vpack.c.bf16 %v1012_v42, %v1011_v41  ;;  %v2253_v25 = vld [vmem:[%s2803_s4 + $0x88] sm:$0xff]  }
  0x28   : > { %2016 = vmatprep.subr.bf16.mxu1 %v2287_v1  ;;  %706 = vmatmul.mubr.bf16.vlgmr.msra.gmra.mrb[0].mxu0 %v460_v35  ;;  %v1007_v35 = vld [vmem:[%s2804_s5 + $0x40] sm:$0xff]  ;;  %v2150_v40 = vpack.c.bf16 %v1010_v39, %v1009_v38  ;;  %v2257_v42 = vld [vmem:[%s2803_s4 + $0x8] sm:$0xff]  }
  0x29   : > { %1895 = vmatpush3.bf16.msra.mxu0 %v2228_v45  ;;  %931 = vmatprep.mubr.bf16.mxu0 %v389_v19  ;;  %v2147_v37 = vpack.c.bf16 %v1008_v36, %v1007_v35  ;;  %v1014_v45 = vld [vmem:[%s2804_s5 + $0x78] sm:$0xff]  ;;  %v2254_v39 = vld [vmem:[%s2803_s4] sm:$0xff]  }
  0x2a   : > { %1896 = vmatprep.subr.bf16.mxu0 %v2229_v47 }
  0x2b   : > { %2017 = vmatpush3.bf16.msra.mxu1 %v2230_v44  ;;  %v1013_v44 = vld [vmem:[%s2804_s5 + $0x70] sm:$0xff] }
  0x2c   : > { %2018 = vmatprep.subr.bf16.mxu1 %v2287_v1  ;;  %v2156_v46 = vpack.c.bf16 %v1014_v45, %v1013_v44  ;;  %v2259_v44 = vld [vmem:[%s2803_s4 + $0x98] sm:$0xff]   ;;  %v2260_v45 = vld [vmem:[%s2803_s4 + $0x10] sm:$0xff]  }
  0x2d   : > { %1897 = vmatpush3.bf16.msra.mxu0 %v2231_v49 }
  0x2e   : > { %1898 = vmatprep.subr.bf16.mxu0 %v2232_v50 }
  0x2f   : > { %2019 = vmatpush3.bf16.msra.mxu1 %v2233_v48 }
  0x30   : > { %2020 = vmatprep.subr.bf16.mxu1 %v2287_v1 }
  0x31   : > { %1899 = vmatpush3.bf16.msra.mxu0 %v2234_v52 }
  0x32   : > { %1900 = vmatprep.subr.bf16.mxu0 %v2235_v53 }
  0x33   : > { %2021 = vmatpush3.bf16.msra.mxu1 %v2236_v51 }
  0x34   : > { %2022 = vmatprep.subr.bf16.mxu1 %v2287_v1 }
  0x35   : > { %1901 = vmatpush3.bf16.msra.mxu0 %v2237_v54 }
  0x36   : > { %1902 = vmatprep.subr.bf16.mxu0 %v2238_v55 }
  0x37   : > { %2023 = vmatpush3.bf16.msra.mxu1 %v2239_v56 }
  0x38   : > { %2024 = vmatprep.subr.bf16.mxu1 %v2287_v1 }
  0x39   : > { %1903 = vmatpush3.bf16.msra.mxu0 %v2240_v59 }
  0x3a   : > { %1904 = vmatprep.subr.bf16.mxu0 %v2241_v62 }
  0x3b   : > { %2025 = vmatpush3.bf16.msra.mxu1 %v2242_v58 }
  0x3c   : > { %2026 = vmatprep.subr.bf16.mxu1 %v2287_v1 }
  0x3d   : > { %1905 = vmatpush3.bf16.msra.mxu0 %v2243_v0 }
  0x3e   : > { %1906 = vmatprep.subr.bf16.mxu0 %v2244_v6 }
  0x3f   : > { %2027 = vmatpush3.bf16.msra.mxu1 %v2245_v4 }
  0x40   : > { %2028 = vmatprep.subr.bf16.mxu1 %v2287_v1 }
  0x41   : > { %1907 = vmatpush3.bf16.msra.mxu0 %v2246_v13 }
  0x42   : > { %1908 = vmatprep.subr.bf16.mxu0 %v2247_v14 }
  0x43   : > { %2029 = vmatpush3.bf16.msra.mxu1 %v2248_v8 }
  0x44   : > { %2069 = vmatprep.subr.mxu1 %v2287_v1 }
  0x45   : > { %1909 = vmatpush3.bf16.msra.mxu0 %v2249_v18 }
  0x46   : > { %2031 = vmatmul.mubr.bf16.vlgmr.msra.gmra.mrb[0].mxu1 %v396_v20  ;;  %2134 = vmatprep.subr.bf16.mxu0 %v2289_v23 }
  0x47   : > { %2071 = vmatprep.mubr.msk.f32.mxu1 %vm2288_vm0, %v2287_v1  ;;  %2070 = vmatpush3.msra.mxu1 %v1101_v21 }
  0x48   : > { %932 = vmatmul.mubr.bf16.vlgmr.msra.gmra.mrb[4].mxu0 %v375_v7 }
  0x49   : > { %2066 = vmatprep.mubr.msk.f32.mxu0 %vm2288_vm0, %v2287_v1  ;;  %2136 = vmatpush3.bf16.msra.mxu0 %v2135_v24  ;;  %v2252_v24 = vld [vmem:[%s2803_s4 + $0x40] sm:$0xff]  }
  0x4a   : > { %2137 = vmatprep.subr.bf16.mxu0 %v2289_v23  ;;  %1944 = vmatprep.subr.bf16.mxu1 %v2252_v24 }
  0x4d   : > { %2139 = vmatpush3.bf16.msra.mxu0 %v2138_v27 }
  0x4e   : > { %2140 = vmatprep.subr.bf16.mxu0 %v2289_v23 }
  0x51   : > { %2142 = vmatpush3.bf16.msra.mxu0 %v2141_v31 }
  0x52   : > { %2143 = vmatprep.subr.bf16.mxu0 %v2289_v23 }
  0x55   : > { %2145 = vmatpush3.bf16.msra.mxu0 %v2144_v34 }
  0x56   : > { %2146 = vmatprep.subr.bf16.mxu0 %v2289_v23 }
  0x59   : > { %2148 = vmatpush3.bf16.msra.mxu0 %v2147_v37 }
  0x5a   : > { %2149 = vmatprep.subr.bf16.mxu0 %v2289_v23 }
  0x5d   : > { %2151 = vmatpush3.bf16.msra.mxu0 %v2150_v40  ;;  %v2255_v40 = vld [vmem:[%s2803_s4 + $0x48] sm:$0xff]  }
  0x5e   : > { %2152 = vmatprep.subr.bf16.mxu0 %v2289_v23 }
  0x61   : > { %2154 = vmatpush3.bf16.msra.mxu0 %v2153_v43  ;;  %v2258_v43 = vld [vmem:[%s2803_s4 + $0x50] sm:$0xff]  }
  0x62   : > { %2155 = vmatprep.subr.bf16.mxu0 %v2289_v23 }
  0x65   : > { %2157 = vmatpush3.bf16.msra.mxu0 %v2156_v46  ;;  %v2261_v46 = vld [vmem:[%s2803_s4 + $0x58] sm:$0xff]  }
  0x66   : > { %2074 = vmatprep.subr.bf16.mxu0 %v2287_v1 }
  0xfb   : > { %v1879_v47 = vpop.f32.mrb[0].mxu0 }
  0xfc   : > { %v1880_v48 = vpop.f32.mrb[1].mxu0 }
  0xfd   : > { %v1881_v49 = vadd.f32 %v1880_v48, %v1879_v47  ;;  %v1882_v50 = vpop.f32.mrb[2].mxu0  ;;  %v2262_v47 = vld [vmem:[%s2803_s4 + $0xa0] sm:$0xff]   ;;  %v2263_v48 = vld [vmem:[%s2803_s4 + $0x18] sm:$0xff]  }
  0xfe   : > { %v1883_v51 = vpop.f32.mrb[3].mxu0 }
  0xff   : > { %v1884_v52 = vadd.f32 %v1883_v51, %v1882_v50  ;;  %v2265_v50 = vld [vmem:[%s2803_s4 + $0xa8] sm:$0xff]   ;;  %v2266_v51 = vld [vmem:[%s2803_s4 + $0x20] sm:$0xff]  }
 0x119   : > { %v974_v53 = vpop.f32.mrb[0].mxu1 }
 0x11a   : > { %v2032_v54 = vpop.f32.mrb[1].mxu1 }
 0x11b   : > { %v977_v55 = vpop.f32.mrb[2].mxu1  ;;  %v1910_v57 = vpop.f32.mrb[4].mxu0  ;;  %v2269_v54 = vld [vmem:[%s2803_s4 + $0x28] sm:$0xff]  }
 0x11c   : > { %v2033_v56 = vpop.f32.mrb[3].mxu1  ;;  %v1911_v58 = vpop.f32.mrb[5].mxu0 }
 0x11d   : > { %v1912_v59 = vadd.f32 %v1911_v58, %v1910_v57  ;;  %v1913_v60 = vpop.f32.mrb[6].mxu0  ;;  %v2271_v56 = vld [vmem:[%s2803_s4 + $0xb8] sm:$0xff]   ;;  %v2272_v57 = vld [vmem:[%s2803_s4 + $0x30] sm:$0xff]  }
 0x11e   : > { %v1914_v61 = vpop.f32.mrb[7].mxu0  ;;  %v2273_v58 = vld [vmem:[%s2803_s4 + $0x78] sm:$0xff]  }
 0x11f   : > { %v2182_v62 = vadd.f32 %v1912_v59, %v1881_v49  ;;  %v1915_v63 = vadd.f32 %v1914_v61, %v1913_v60  ;;  %v2264_v49 = vld [vmem:[%s2803_s4 + $0x60] sm:$0xff]   ;;  %v2274_v59 = vld [vmem:[%s2803_s4 + $0x38] sm:$0xff]   ;;  %v1176_v60 = vlaneseq }
 0x121   : > { %v2608_v0 = vadd.f32 %v2182_v62, %v974_v53  ;;  %v2184_v2 = vadd.f32 %v1915_v63, %v1884_v52  ;;  %v2267_v52 = vld [vmem:[%s2803_s4 + $0x68] sm:$0xff]   ;;  %v2268_v53 = vld [vmem:[%s2803_s4 + $0xb0] sm:$0xff]   ;;  %v2707_v61 = vshrl.u32 %v1176_v60, 7 }
 0x123   : > { %v2610_v3 = vadd.f32 %v2184_v2, %v977_v55  ;;  %v988_v4 = vmul.f32 %v2608_v0, %v2608_v0  ;;  %v2270_v55 = vld [vmem:[%s2803_s4 + $0x70] sm:$0xff]   ;;  %v1178_v62 = vsub.s32 0, %v2707_v61  ;;  %v1184_v63 = vsub.s32 1, %v2707_v61 }
 0x125   : > { %v981_v5 = vadd.f32 %v2610_v3, %v2608_v0  ;;  %v989_v6 = vmul.f32 %v2610_v3, %v2610_v3 }
 0x127   : > { %v982_v7 = vrot.slane %v981_v5, 4  ;;  %v990_v8 = vadd.f32 %v989_v6, %v988_v4 }
 0x129   : > { %v983_v9 = vadd.f32 %v982_v7, %v981_v5  ;;  %v991_v10 = vrot.slane %v990_v8, 4 }
 0x12b   : > { %v984_v11 = vrot.slane %v983_v9, 2  ;;  %v992_v12 = vadd.f32 %v991_v10, %v990_v8 }
 0x12d   : > { %v985_v13 = vadd.f32 %v984_v11, %v983_v9  ;;  %v993_v14 = vrot.slane %v992_v12, 2 }
 0x12f   : > { %v986_v15 = vrot.slane %v985_v13, 1  ;;  %v994_v16 = vadd.f32 %v993_v14, %v992_v12 }
 0x131   : > { %v995_v17 = vrot.slane %v994_v16, 1  ;;  %v987_v18 = vadd.f32 %v986_v15, %v985_v13 }
 0x133   : > { %v996_v19 = vadd.f32 %v995_v17, %v994_v16 }
 0x135   : > { %v998_v20 = vsel %vm372_vm1, %v987_v18, %v996_v19 }
 0x136   : > { %2067 = vmatmul.mubr.f32.vlgmr.msra.gmra.mrb[8].mxu0 %v998_v20 }
 0x137   : > { %2090 = vmatprep.mubr.msk.bf16.mxu0 %vm2288_vm0, %v2287_v1  ;;  %2075 = vmatpush3.bf16.msra.mxu0 %v2251_v22 }
 0x138   : > { %2076 = vmatprep.subr.bf16.mxu0 %v2287_v1 }
 0x13b   : > { %2077 = vmatpush3.bf16.msra.mxu0 %v2253_v25 }
 0x13c   : > { %2078 = vmatprep.subr.bf16.mxu0 %v2287_v1 }
 0x13f   : > { %2079 = vmatpush3.bf16.msra.mxu0 %v2256_v26  ;;  %v1512_v26 = vld [vmem:[%s2805_s6] sm:$0xff] }
 0x140   : > { %2080 = vmatprep.subr.bf16.mxu0 %v2287_v1 }
 0x143   : > { %2081 = vmatpush3.bf16.msra.mxu0 %v2259_v44  ;;  %v1523_v44 = vld [vmem:[%s2805_s6 + $0x58] sm:$0xff] }
 0x144   : > { %2082 = vmatprep.subr.bf16.mxu0 %v2287_v1 }
 0x147   : > { %2083 = vmatpush3.bf16.msra.mxu0 %v2262_v47  ;;  %v1525_v47 = vld [vmem:[%s2805_s6 + $0x68] sm:$0xff] }
 0x148   : > { %2084 = vmatprep.subr.bf16.mxu0 %v2287_v1 }
 0x14b   : > { %2085 = vmatpush3.bf16.msra.mxu0 %v2265_v50  ;;  %v1527_v50 = vld [vmem:[%s2805_s6 + $0x78] sm:$0xff] }
 0x14c   : > { %2086 = vmatprep.subr.bf16.mxu0 %v2287_v1 }
 0x14f   : > { %2087 = vmatpush3.bf16.msra.mxu0 %v2268_v53 }
 0x150   : > { %2088 = vmatprep.subr.bf16.mxu0 %v2287_v1 }
 0x153   : > { %2089 = vmatpush3.bf16.msra.mxu0 %v2271_v56 }
 0x154   : > { %2129 = vmatprep.subr.mxu0 %v2287_v1 }
 0x209   : > { %v1081_v27 = vpop.f32.mrb[8].mxu0 }
 0x20a   : > { %v1085_v28 = vmul.f32 0.00390625, %v1081_v27  ;;  %v2068_v29 = vpop.f32.mrb[9].mxu0  ;;  %v1513_v27 = vld [vmem:[%s2805_s6 + $0x8] sm:$0xff] }
 0x20b   : > { %v2159_v29 = vpack.c.bf16 %v1513_v27, %v1512_v26 }
 0x20c   : > { %v1086_v31 = vmul.f32 %v1085_v28, %v1085_v28 }
 0x20e   : > { %v1088_v32 = vrot.slane %v1086_v31, 7 }
 0x210   : > { %v1090_v33 = vsub.f32 %v1085_v28, %v1088_v32  ;;  %v1514_v32 = vld [vmem:[%s2805_s6 + $0x10] sm:$0xff] }
 0x212   : > { %v1091_v34 = vadd.f32 1e-05, %v1090_v33  ;;  %v1515_v33 = vld [vmem:[%s2805_s6 + $0x18] sm:$0xff] }
 0x214   : > { %2275 = vrsqrt.f32 %v1091_v34  ;;  %v2162_v34 = vpack.c.bf16 %v1515_v33, %v1514_v32 }
 0x21e   : > { %v2276_v35 = vpop.eup %2275 }
 0x21f   : > { %v1094_v36 = vrot.slane %v2276_v35, 1  ;;  %v1516_v35 = vld [vmem:[%s2805_s6 + $0x20] sm:$0xff] }
 0x221   : > { %v1096_v37 = vmul.f32 %v1094_v36, %v1085_v28 }
 0x223   : > { %v1098_v38 = vrot.slane %v1096_v37, 7  ;;  %v1518_v37 = vld [vmem:[%s2805_s6 + $0x30] sm:$0xff] }
 0x225   : > { %v1100_v41 = vsel %vm372_vm1, %v1094_v36, %v1098_v38  ;;  %v1519_v38 = vld [vmem:[%s2805_s6 + $0x38] sm:$0xff] }
 0x226   : > { %2072 = vmatmul.mubr.msk.f32.vlgmr.msra.gmra.mrb[4].mxu1 %vm1102_vm6, %v1100_v41  ;;  %v1521_v41 = vld [vmem:[%s2805_s6 + $0x48] sm:$0xff] }
 0x227   : > { %1945 = vmatpush3.bf16.msra.mxu1 %v2254_v39  ;;  %v2168_v39 = vpack.c.bf16 %v1519_v38, %v1518_v37 }
 0x228   : > { %1946 = vmatprep.subr.bf16.mxu1 %v2255_v40  ;;  %v1520_v40 = vld [vmem:[%s2805_s6 + $0x40] sm:$0xff] }
 0x22b   : > { %1947 = vmatpush3.bf16.msra.mxu1 %v2257_v42  ;;  %v2171_v42 = vpack.c.bf16 %v1521_v41, %v1520_v40 }
 0x22c   : > { %1948 = vmatprep.subr.bf16.mxu1 %v2258_v43  ;;  %v1522_v43 = vld [vmem:[%s2805_s6 + $0x50] sm:$0xff] }
 0x22f   : > { %1949 = vmatpush3.bf16.msra.mxu1 %v2260_v45  ;;  %v2174_v45 = vpack.c.bf16 %v1523_v44, %v1522_v43 }
 0x230   : > { %1950 = vmatprep.subr.bf16.mxu1 %v2261_v46  ;;  %v1524_v46 = vld [vmem:[%s2805_s6 + $0x60] sm:$0xff] }
 0x233   : > { %1951 = vmatpush3.bf16.msra.mxu1 %v2263_v48  ;;  %v2177_v48 = vpack.c.bf16 %v1525_v47, %v1524_v46 }
 0x234   : > { %1952 = vmatprep.subr.bf16.mxu1 %v2264_v49  ;;  %v1526_v49 = vld [vmem:[%s2805_s6 + $0x70] sm:$0xff] }
 0x237   : > { %1953 = vmatpush3.bf16.msra.mxu1 %v2266_v51  ;;  %v2180_v51 = vpack.c.bf16 %v1527_v50, %v1526_v49 }
 0x238   : > { %1954 = vmatprep.subr.bf16.mxu1 %v2267_v52 }
 0x23b   : > { %1955 = vmatpush3.bf16.msra.mxu1 %v2269_v54 }
 0x23c   : > { %1956 = vmatprep.subr.bf16.mxu1 %v2270_v55 }
 0x23f   : > { %1957 = vmatpush3.bf16.msra.mxu1 %v2272_v57 }
 0x240   : > { %1958 = vmatprep.subr.bf16.mxu1 %v2273_v58 }
 0x243   : > { %1959 = vmatpush3.bf16.msra.mxu1 %v2274_v59 }
 0x244   : > { %2158 = vmatprep.subr.bf16.mxu1 %v2289_v23 }
 0x2f9   : > { %v1172_v2 = vpop.f32.mrb[4].mxu1 }
 0x2fa   : > { %v1179_v4 = vrot.slane %v1172_v2, %v1178_v62  ;;  %v2073_v5 = vpop.f32.mrb[5].mxu1  ;;  %v1185_v8 = vrot.slane %v1172_v2, %v1184_v63 }
 0x2fc   : > { %v1180_v6 = vmul.f32 %v2608_v0, %v1179_v4  ;;  %v1181_v7 = vmul.f32 %v2610_v3, %v1179_v4 }
 0x2fe   : > { %v1186_v9 = vsub.f32 %v1180_v6, %v1185_v8  ;;  %v1187_v10 = vsub.f32 %v1181_v7, %v1185_v8 }
 0x300   : > { %v1188_v11 = vmax.f32 %v1186_v9, 0.0  ;;  %v1189_v12 = vmax.f32 %v1187_v10, 0.0 }
 0x302   : > { %v1190_v13 = vpack.c.bf16 %v1189_v12, %v1188_v11 }
 0x304   : > { %v1192_v14 = vshrl.u32 %v1190_v13, 16  ;;  %v1195_v16 = vshll.u32 %v1190_v13, 16 }
 0x306   : > { %v1194_v15 = vrot.slane %v1192_v14, 7 }
 0x308   : > { %v1197_v17 = vor.u32 %v1195_v16, %v1194_v15  ;;  %v1201_v18 = vsel %vm2446_vm3, %v1194_v15, 0 }
 0x309   : > { %v1218_v3 = vrot.slane %v1201_v18, 1  ;;  %v1210_v21 = vshll.u32 %v1201_v18, 16 }
 0x30a   : > { %v1200_v0 = vsel %vm2446_vm3, 0, %v1197_v17 }
 0x30b   : > { %v1217_v19 = vrot.slane %v1200_v0, 1  ;;  %v1205_v20 = vshll.u32 %v1200_v0, 16  ;;  %v1203_v24 = vshrl.u32 %v1200_v0, 16  ;;  %v1212_v30 = vrot.slane %v1210_v21, 1 }
 0x30d   : > { %v1219_v22 = vsel %vm393_vm4, %v1217_v19, %v1218_v3  ;;  %v1207_v25 = vrot.slane %v1205_v20, 1  ;;  %v1614_v20 = vld [vmem:[%s2807_s8] sm:$0xff] }
 0x30e   : > { %2091 = vmatmul.mubr.bf16.vlgmr.msra.gmra.mrb[12].mxu0 %v1219_v22 }
 0x30f   : > { %v1208_v28 = vor.u32 %v1207_v25, %v1203_v24  ;;  %2131 = vmatprep.mubr.msk.f32.mxu0 %vm2288_vm0, %v2287_v1  ;;  %2130 = vmatpush3.msra.mxu0 %v1614_v20 }
 0x311   : > { %v1213_v31 = vsel %vm377_vm5, %v1208_v28, %v1212_v30 }
 0x312   : > { %1445 = vmatprep.mubr.bf16.mxu1 %v1213_v31 }
 0x313   : > { %1446 = vmatmul.mubr.bf16.vlgmr.msra.gmra.mrb[8].mxu1 %v1200_v0 }
 0x314   : > { %2160 = vmatpush3.bf16.msra.mxu1 %v2159_v29  ;;  %2126 = vmatprep.mubr.msk.f32.mxu1 %vm2288_vm0, %v2287_v1  ;;  %v1517_v1 = vld [vmem:[%s2805_s6 + $0x28] sm:$0xff] }
 0x315   : > { %2161 = vmatprep.subr.bf16.mxu1 %v2289_v23  ;;  %v2165_v36 = vpack.c.bf16 %v1517_v1, %v1516_v35 }
 0x318   : > { %2163 = vmatpush3.bf16.msra.mxu1 %v2162_v34 }
 0x319   : > { %2164 = vmatprep.subr.bf16.mxu1 %v2289_v23 }
 0x31c   : > { %2166 = vmatpush3.bf16.msra.mxu1 %v2165_v36 }
 0x31d   : > { %2167 = vmatprep.subr.bf16.mxu1 %v2289_v23 }
 0x320   : > { %2169 = vmatpush3.bf16.msra.mxu1 %v2168_v39 }
 0x321   : > { %2170 = vmatprep.subr.bf16.mxu1 %v2289_v23 }
 0x324   : > { %2172 = vmatpush3.bf16.msra.mxu1 %v2171_v42 }
 0x325   : > { %2173 = vmatprep.subr.bf16.mxu1 %v2289_v23 }
 0x328   : > { %2175 = vmatpush3.bf16.msra.mxu1 %v2174_v45 }
 0x329   : > { %2176 = vmatprep.subr.bf16.mxu1 %v2289_v23 }
 0x32c   : > { %2178 = vmatpush3.bf16.msra.mxu1 %v2177_v48 }
 0x32d   : > { %2179 = vmatprep.subr.bf16.mxu1 %v2289_v23 }
 0x330   : > { %2181 = vmatpush3.bf16.msra.mxu1 %v2180_v51 }
 0x3e1   : > { %v1488_v52 = vpop.f32.mrb[12].mxu0 }
 0x3e2   : > { %v2092_v53 = vpop.f32.mrb[13].mxu0 }
 0x3e3   : > { %v1491_v54 = vpop.f32.mrb[14].mxu0 }
 0x3e4   : > { %v2093_v55 = vpop.f32.mrb[15].mxu0 }
 0x3e6   : > { %v1960_v56 = vpop.f32.mrb[8].mxu1 }
 0x3e7   : > { %v1961_v57 = vpop.f32.mrb[9].mxu1 }
 0x3e8   : > { %v1962_v58 = vadd.f32 %v1961_v57, %v1960_v56  ;;  %v1963_v59 = vpop.f32.mrb[10].mxu1 }
 0x3e9   : > { %v1964_v60 = vpop.f32.mrb[11].mxu1 }
 0x3ea   : > { %v1489_v2 = vadd.f32 %v1962_v58, %v1488_v52  ;;  %v1965_v4 = vadd.f32 %v1964_v60, %v1963_v59 }
 0x3ec   : > { %v1492_v5 = vadd.f32 %v1965_v4, %v1491_v54  ;;  %v1502_v6 = vmul.f32 %v1489_v2, %v1489_v2 }
 0x3ee   : > { %v1495_v7 = vadd.f32 %v1492_v5, %v1489_v2  ;;  %v1503_v8 = vmul.f32 %v1492_v5, %v1492_v5 }
 0x3f0   : > { %v1496_v9 = vrot.slane %v1495_v7, 4  ;;  %v1504_v10 = vadd.f32 %v1503_v8, %v1502_v6 }
 0x3f2   : > { %v1497_v11 = vadd.f32 %v1496_v9, %v1495_v7  ;;  %v1505_v23 = vrot.slane %v1504_v10, 4 }
 0x3f4   : > { %v1498_v12 = vrot.slane %v1497_v11, 2  ;;  %v1506_v13 = vadd.f32 %v1505_v23, %v1504_v10 }
 0x3f6   : > { %v1499_v14 = vadd.f32 %v1498_v12, %v1497_v11  ;;  %v1507_v15 = vrot.slane %v1506_v13, 2 }
 0x3f8   : > { %v1500_v16 = vrot.slane %v1499_v14, 1  ;;  %v1508_v17 = vadd.f32 %v1507_v15, %v1506_v13 }
 0x3fa   : > { %v1509_v18 = vrot.slane %v1508_v17, 1  ;;  %v1501_v0 = vadd.f32 %v1500_v16, %v1499_v14 }
 0x3fc   : > { %v1510_v19 = vadd.f32 %v1509_v18, %v1508_v17 }
 0x3fe   : > { %v1511_v3 = vsel %vm372_vm1, %v1501_v0, %v1510_v19 }
 0x3ff   : > { %2127 = vmatmul.mubr.f32.vlgmr.msra.gmra.mrb[6].mxu1 %v1511_v3 }
 0x4d2   : > { %v1594_v21 = vpop.f32.mrb[6].mxu1 }
 0x4d3   : > { %v1598_v22 = vmul.f32 0.00390625, %v1594_v21  ;;  %v2128_v24 = vpop.f32.mrb[7].mxu1 }
 0x4d5   : > { %v1599_v25 = vmul.f32 %v1598_v22, %v1598_v22 }
 0x4d7   : > { %v1601_v26 = vrot.slane %v1599_v25, 7 }
 0x4d9   : > { %v1603_v27 = vsub.f32 %v1598_v22, %v1601_v26 }
 0x4db   : > { %v1604_v28 = vadd.f32 1e-05, %v1603_v27 }
 0x4dd   : > { %2277 = vrsqrt.f32 %v1604_v28 }
 0x4e7   : > { %v2278_v30 = vpop.eup %2277 }
 0x4e8   : > { %v1607_v29 = vrot.slane %v2278_v30, 1 }
 0x4ea   : > { %v1609_v31 = vmul.f32 %v1607_v29, %v1598_v22 }
 0x4ec   : > { %v1611_v32 = vrot.slane %v1609_v31, 7 }
 0x4ee   : > { %v1613_v33 = vsel %vm372_vm1, %v1607_v29, %v1611_v32 }
 0x4ef   : > { %2132 = vmatmul.mubr.msk.f32.vlgmr.msra.gmra.mrb[10].mxu0 %vm1102_vm6, %v1613_v33 }
 0x5c2   : > { %v1684_v34 = vpop.f32.mrb[10].mxu0 }
 0x5c3   : > { %v1691_v35 = vrot.slane %v1684_v34, %v1178_v62  ;;  %v2133_v1 = vpop.f32.mrb[11].mxu0  ;;  %v1697_v38 = vrot.slane %v1684_v34, %v1184_v63 }
 0x5c5   : > { %v1692_v36 = vmul.f32 %v1691_v35, %v1489_v2  ;;  %v1693_v37 = vmul.f32 %v1691_v35, %v1492_v5 }
 0x5c7   : > { %v1698_v39 = vsub.f32 %v1692_v36, %v1697_v38  ;;  %v1699_v40 = vsub.f32 %v1693_v37, %v1697_v38 }
 0x5c9   : > { %v1700_v41 = vmax.f32 %v1698_v39, 0.0  ;;  %v1701_v42 = vmax.f32 %v1699_v40, 0.0 }
 0x5cb   : > { %1702 = vst [vmem:[%s352_s25] sm:$0xff] %v1700_v41  ;;  %1703 = vst [vmem:[%s352_s25 + $0x8] sm:$0xff] %v1701_v42 }
 0x5cc PF: > { %s19_s30 = sadd.s32 1, %s2285_s30  }
 0x5cd   : > { %p16_p4 = scmp.ge.s32.totalorder %s19_s30, 4  }
 0x5cf   :  { %18 = sbr.rel (!%p16_p4) target bundleno = 1 (0x1), region = 89 }

</bundles_post_ra>
